<compile_context>
chip_gen: v5e
topology: v5e:2x2
jax: 0.10.0
libtpu: 0.0.40
codegen_flags: <defaults>
</compile_context>

<pallas_src>
import functools
from typing import NamedTuple

import jax
import jax.numpy as jnp
from jax.experimental import pallas as pl
from jax.experimental.pallas import tpu as pltpu

EPS = 1e-6  # RMSNorm epsilon


def _round_up(v: int, m: int) -> int:
    return (v + m - 1) // m * m


def _pad2d(a, rows: int, cols: int):
    return jnp.pad(a, ((0, rows - a.shape[0]), (0, cols - a.shape[1])))


class XGLUWeights(NamedTuple):
    """Padded / bf16-cast weights, built ONCE at init by prepare_xglu_weights()."""
    win: jax.Array   # (dim_p, rank_p + hid_p) bf16 = concat([compress, up], axis=1)
    wc: jax.Array    # (dim_p, rank_p)  bf16   compress
    wu: jax.Array    # (dim_p, hid_p)   bf16   up
    wg: jax.Array    # (rank_p, hid_p)  bf16   gate
    wd: jax.Array    # (hid_p, dim_p)   bf16   down
    g: jax.Array     # (1, rank_p)      f32    RMSNorm gain with (rank/dim) folded in
    dim: int
    rank: int
    hidden: int
    dim_p: int
    rank_p: int
    hid_p: int


def prepare_xglu_weights(wc, g_rms, wu, wg, wd) -> XGLUWeights:
    """Pad every feature axis to a multiple of 128 (lane-dense) and cast to bf16.

    Padded rows/columns are exactly zero, so reductions / matmuls over padded axes
    are exact. The constant (rank/dim) scale is folded into the RMSNorm gain here.
    """
    dim, rank = wc.shape
    hidden = wu.shape[1]
    dim_p, rank_p, hid_p = (_round_up(v, 128) for v in (dim, rank, hidden))
    bf16 = jnp.bfloat16
    wc_p = _pad2d(wc, dim_p, rank_p).astype(bf16)
    wu_p = _pad2d(wu, dim_p, hid_p).astype(bf16)
    wg_p = _pad2d(wg, rank_p, hid_p).astype(bf16)
    wd_p = _pad2d(wd, hid_p, dim_p).astype(bf16)
    win_p = jnp.concatenate([wc_p, wu_p], axis=1)   # fused x-LHS projection
    g_p = _pad2d((g_rms * (rank / dim)).reshape(1, rank).astype(jnp.float32), 1, rank_p)
    return XGLUWeights(win=win_p, wc=wc_p, wu=wu_p, wg=wg_p, wd=wd_p, g=g_p,
                       dim=dim, rank=rank, hidden=hidden,
                       dim_p=dim_p, rank_p=rank_p, hid_p=hid_p)


# ---------------------------------------------------------------------------
# Kernels
# ---------------------------------------------------------------------------

def _xglu_resident_kernel(x_ref, win_ref, g_ref, wg_ref, wd_ref, o_ref, *, rank, rank_p):
    """One (tm, dim_p) token tile; all weights resident in VMEM.

    compress(x) and up(x) share x as LHS -> a single fused MXU matmul, then a
    lane-aligned static slice at column rank_p. bf16 MXU operands, f32 accumulation;
    all VPU/elementwise math in f32.
    """
    x = x_ref[...]                                                        # (tm, dim_p) bf16
    xcu = jnp.dot(x, win_ref[...], preferred_element_type=jnp.float32)   # (tm, rank_p+hid_p) f32
    xc = xcu[:, :rank_p]                                                  # compress(x), f32
    up_x = xcu[:, rank_p:]                                                # up(x), f32

    # RMSNorm over the TRUE rank (padded columns are exactly zero), gain has
    # (rank/dim) folded in host-side.
    ms = jnp.sum(xc * xc, axis=-1, keepdims=True) * (1.0 / rank)
    xc = xc * jax.lax.rsqrt(ms + EPS) * g_ref[...]

    # forward swaps up/gate:  activation applied to up(x); multiplied by gate(xc)
    gate_xc = jnp.dot(xc.astype(jnp.bfloat16), wg_ref[...],
                      preferred_element_type=jnp.float32)                 # (tm, hid_p) f32
    h = (up_x * jax.nn.sigmoid(up_x)) * gate_xc                           # silu(up(x)) * gate(xc)

    out = jnp.dot(h.astype(jnp.bfloat16), wd_ref[...],
                  preferred_element_type=jnp.float32)                     # (tm, dim_p) f32
    o_ref[...] = out.astype(o_ref.dtype)


def _xglu_hidden_tiled_kernel(x_ref, wc_ref, g_ref, wu_ref, wg_ref, wd_ref, o_ref,
                              xc_sc, acc_sc, *, rank):
    """Hidden-axis tiled path: grid = (token_tiles, hidden_tiles), hidden 'arbitrary'.

    xc (normalized compress output) is computed once per token tile at k == 0 and kept
    in VMEM scratch; each hidden tile contributes its slice of the down projection into
    a (tm, dim_p) f32 accumulator (pl.when init/finalize)."""
    k = pl.program_id(1)

    @pl.when(k == 0)
    def _():
        xc = jnp.dot(x_ref[...], wc_ref[...], preferred_element_type=jnp.float32)
        ms = jnp.sum(xc * xc, axis=-1, keepdims=True) * (1.0 / rank)
        xc = xc * jax.lax.rsqrt(ms + EPS) * g_ref[...]
        xc_sc[...] = xc.astype(xc_sc.dtype)
        acc_sc[...] = jnp.zeros_like(acc_sc)

    up_x = jnp.dot(x_ref[...], wu_ref[...], preferred_element_type=jnp.float32)   # (tm, th)
    gate_xc = jnp.dot(xc_sc[...], wg_ref[...], preferred_element_type=jnp.float32)
    h = (up_x * jax.nn.sigmoid(up_x)) * gate_xc
    acc_sc[...] += jnp.dot(h.astype(jnp.bfloat16), wd_ref[...],
                           preferred_element_type=jnp.float32)

    @pl.when(k == pl.num_programs(1) - 1)
    def _():
        o_ref[...] = acc_sc[...].astype(o_ref.dtype)


# ---------------------------------------------------------------------------
# Wrapper
# ---------------------------------------------------------------------------

def xglu_pallas(x, w: XGLUWeights, *, tm=256, th=None, out_dtype=jnp.bfloat16,
                vmem_limit_bytes=48 * 1024 * 1024):
    """x: (N, dim). Returns (N, dim) in out_dtype (default bf16).

    th=None  -> resident-weight path (weights stay in VMEM, fused compress+up matmul).
    th=int   -> hidden-axis tiled path for production sizes (v7x VMEM budget).
    Callers may pass a pre-padded bf16 (N_p, dim_p) activation slab to skip the
    per-call pad/cast pass entirely.
    """
    n, d = x.shape
    assert d in (w.dim, w.dim_p), f"x feature dim {d} != weights dim {w.dim}"

    n_p = _round_up(max(n, 1), 128)
    tm = max(128, _round_up(int(tm), 128))
    tm = min(tm, n_p)
    grid_m = pl.cdiv(n_p, tm)

    if x.shape == (n_p, w.dim_p) and x.dtype == jnp.bfloat16:
        x_p = x                                   # zero-copy fast path
    else:
        x_p = _pad2d(x.astype(jnp.bfloat16), n_p, w.dim_p)

    if th is not None:
        th_i = max(128, _round_up(int(th), 128))
        if w.hid_p % th_i != 0:
            raise ValueError(f"th={th_i} must divide padded hidden dim {w.hid_p}")
        grid_k = w.hid_p // th_i

    def _call(single_buffer_weights):
        # Constant-index weight blocks never change across the grid -> a second
        # pipeline buffer is pure VMEM waste; request single buffering when supported.
        wmode = ({"pipeline_mode": pl.Buffered(1)} if single_buffer_weights else {})

        if th is None:
            return pl.pallas_call(
                functools.partial(_xglu_resident_kernel, rank=w.rank, rank_p=w.rank_p),
                out_shape=jax.ShapeDtypeStruct((n_p, w.dim_p), out_dtype),
                grid=(grid_m,),
                in_specs=[
                    pl.BlockSpec((tm, w.dim_p), lambda i: (i, 0)),                       # token tile
                    pl.BlockSpec((w.dim_p, w.rank_p + w.hid_p), lambda i: (0, 0), **wmode),
                    pl.BlockSpec((1, w.rank_p), lambda i: (0, 0), **wmode),
                    pl.BlockSpec((w.rank_p, w.hid_p), lambda i: (0, 0), **wmode),
                    pl.BlockSpec((w.hid_p, w.dim_p), lambda i: (0, 0), **wmode),
                ],
                out_specs=pl.BlockSpec((tm, w.dim_p), lambda i: (i, 0)),
                compiler_params=pltpu.CompilerParams(
                    dimension_semantics=("parallel",),       # token axis shards across TCs
                    vmem_limit_bytes=vmem_limit_bytes,
                ),
            )(x_p, w.win, w.g, w.wg, w.wd)

        return pl.pallas_call(
            functools.partial(_xglu_hidden_tiled_kernel, rank=w.rank),
            out_shape=jax.ShapeDtypeStruct((n_p, w.dim_p), out_dtype),
            grid=(grid_m, grid_k),
            in_specs=[
                pl.BlockSpec((tm, w.dim_p), lambda i, k: (i, 0)),
                pl.BlockSpec((w.dim_p, w.rank_p), lambda i, k: (0, 0), **wmode),
                pl.BlockSpec((1, w.rank_p), lambda i, k: (0, 0), **wmode),
                pl.BlockSpec((w.dim_p, th_i), lambda i, k: (0, k)),
                pl.BlockSpec((w.rank_p, th_i), lambda i, k: (0, k)),
                pl.BlockSpec((th_i, w.dim_p), lambda i, k: (k, 0)),
            ],
            out_specs=pl.BlockSpec((tm, w.dim_p), lambda i, k: (i, 0)),
            scratch_shapes=[
                pltpu.VMEM((tm, w.rank_p), jnp.bfloat16),    # normalized xc, reused over k
                pltpu.VMEM((tm, w.dim_p), jnp.float32),      # down-projection accumulator
            ],
            compiler_params=pltpu.CompilerParams(
                dimension_semantics=("parallel", "arbitrary"),
                vmem_limit_bytes=vmem_limit_bytes,
            ),
        )(x_p, w.wc, w.g, w.wu, w.wg, w.wd)

    try:
        out = _call(True)
    except Exception:
        # pl.Buffered(1) not supported on this jax version -> default double buffering.
        out = _call(False)

    return out[:n, :w.dim]


# ---------------------------------------------------------------------------
# Pure-JAX references
# ---------------------------------------------------------------------------

def _silu(x):
    return x * jax.nn.sigmoid(x)


def xglu_reference_f32(x, wc, g_rms, wu, wg, wd, rank, dim):
    """Plain-JAX f32 mirror of XGLU.forward."""
    xc = x @ wc
    xc = xc * jax.lax.rsqrt(jnp.mean(xc * xc, axis=-1, keepdims=True) + EPS)
    xc = xc * g_rms * (rank / dim)
    up = x @ wu
    gate = xc @ wg
    up, gate = gate, up          # the swap in XGLU.forward
    gate = _silu(gate)
    return (gate * up) @ wd


def xglu_reference_mixed(x, wc, g_rms, wu, wg, wd, rank, dim):
    """Same math, emulating the kernel's bf16-operand / f32-accumulate precision."""
    bf16 = jnp.bfloat16
    xb = x.astype(bf16)
    xc = jnp.dot(xb, wc.astype(bf16), preferred_element_type=jnp.float32)
    xc = xc * jax.lax.rsqrt(jnp.mean(xc * xc, axis=-1, keepdims=True) + EPS)
    xc = xc * (g_rms * (rank / dim))
    up = jnp.dot(xb, wu.astype(bf16), preferred_element_type=jnp.float32)
    gate = jnp.dot(xc.astype(bf16), wg.astype(bf16), preferred_element_type=jnp.float32)
    up, gate = gate, up
    gate = _silu(gate)
    return jnp.dot((gate * up).astype(bf16), wd.astype(bf16),
                   preferred_element_type=jnp.float32)


# ---------------------------------------------------------------------------
# Demo / self-test
# ---------------------------------------------------------------------------

if __name__ == "__main__":
    # --- Small shapes consistent with the module defaults --------------------
    B, S, dim = 2, 8, 32
    rank = 128                                     # xglu_rank default
    hidden = 4 * dim                               # hidden_dim default rule
    hidden = int(2 * hidden / 3)
    hidden = 4 * ((hidden + 3) // 4)               # -> 88

    key = jax.random.PRNGKey(0)
    kx, kc, ku, kg, kd = jax.random.split(key, 5)
    in_std = dim ** -0.5
    out_std = hidden ** -0.5

    x = jax.random.normal(kx, (B, S, dim), dtype=jnp.float32)
    wc = jax.random.truncated_normal(kc, -3.0, 3.0, (dim, rank), jnp.float32) * in_std
    wu = jax.random.truncated_normal(ku, -3.0, 3.0, (dim, hidden), jnp.float32) * in_std
    wg = jax.random.truncated_normal(kg, -3.0, 3.0, (rank, hidden), jnp.float32) * in_std
    wd = jax.random.truncated_normal(kd, -3.0, 3.0, (hidden, dim), jnp.float32) * out_std
    g_rms = jnp.ones((rank,), dtype=jnp.float32)   # RMSNorm weight (init = 1)

    weights = prepare_xglu_weights(wc, g_rms, wu, wg, wd)   # ONCE, at init
    x2d = x.reshape(B * S, dim)

    # Resident-weight path (fused compress+up matmul).
    out = xglu_pallas(x2d, weights, tm=256)
    out = jax.block_until_ready(out)
    assert out.shape == (B * S, dim)
    out_f32 = out.astype(jnp.float32)

    ref_mixed = xglu_reference_mixed(x2d, wc, g_rms, wu, wg, wd, rank, dim)
    ref_f32 = xglu_reference_f32(x2d, wc, g_rms, wu, wg, wd, rank, dim)
    assert jnp.allclose(out_f32, ref_mixed, atol=2e-2, rtol=2e-2), \
        "mismatch vs mixed-precision reference (resident path)"
    assert jnp.allclose(out_f32, ref_f32, atol=3e-1, rtol=1e-1), \
        "mismatch vs f32 reference (resident path)"
    _ = out.reshape(B, S, dim)   # back to the PyTorch (B, S, dim) view

    # --- Exercise the hidden-tiled (production / v7x) path -------------------
    # Small-but-real tiling: 2 token tiles x 2 hidden tiles with an f32 accumulator.
    dim2, rank2, hidden2, n2 = 128, 128, 256, 256
    k2 = jax.random.split(jax.random.PRNGKey(1), 5)
    x2 = jax.random.normal(k2[0], (n2, dim2), jnp.float32)
    wc2 = jax.random.truncated_normal(k2[1], -3.0, 3.0, (dim2, rank2), jnp.float32) * dim2 ** -0.5
    wu2 = jax.random.truncated_normal(k2[2], -3.0, 3.0, (dim2, hidden2), jnp.float32) * dim2 ** -0.5
    wg2 = jax.random.truncated_normal(k2[3], -3.0, 3.0, (rank2, hidden2), jnp.float32) * dim2 ** -0.5
    wd2 = jax.random.truncated_normal(k2[4], -3.0, 3.0, (hidden2, dim2), jnp.float32) * hidden2 ** -0.5
    g2 = jnp.ones((rank2,), jnp.float32)

    weights2 = prepare_xglu_weights(wc2, g2, wu2, wg2, wd2)
    # Pre-padded bf16 activations -> wrapper's zero-copy fast path.
    out2 = xglu_pallas(x2.astype(jnp.bfloat16), weights2, tm=128, th=128)
    out2 = jax.block_until_ready(out2)
    assert out2.shape == (n2, dim2)
    ref2 = xglu_reference_mixed(x2, wc2, g2, wu2, wg2, wd2, rank2, dim2)
    assert jnp.allclose(out2.astype(jnp.float32), ref2, atol=2e-2, rtol=2e-2), \
        "mismatch vs mixed-precision reference (hidden-tiled path)"

    print("KERNEL_OK")
</pallas_src>

<mosaic_0001>
module attributes {stable_mosaic.version = 11 : i64} {
  func.func @_xglu_resident_kernel(%arg0: i32, %arg1: memref<128x128xbf16, #tpu.memory_space<vmem>>, %arg2: memref<128x256xbf16, #tpu.memory_space<vmem>>, %arg3: memref<1x128xf32, #tpu.memory_space<vmem>>, %arg4: memref<128x128xbf16, #tpu.memory_space<vmem>>, %arg5: memref<128x128xbf16, #tpu.memory_space<vmem>>, %arg6: memref<128x128xbf16, #tpu.memory_space<vmem>>) attributes {dimension_semantics = [#tpu.dimension_semantics<parallel>], iteration_bounds = array<i64: 1>, scalar_prefetch = 0 : i64, scratch_operands = 0 : i64, tpu.core_type = #tpu.core_type<tc>, window_params = [{transform_indices = @transform_0, window_bounds = array<i64: 128, 128>}, {pipeline_mode = #tpu.pipeline_mode<synchronous>, transform_indices = @transform_1, window_bounds = array<i64: 128, 256>}, {pipeline_mode = #tpu.pipeline_mode<synchronous>, transform_indices = @transform_2, window_bounds = array<i64: 1, 128>}, {pipeline_mode = #tpu.pipeline_mode<synchronous>, transform_indices = @transform_3, window_bounds = array<i64: 128, 128>}, {pipeline_mode = #tpu.pipeline_mode<synchronous>, transform_indices = @transform_4, window_bounds = array<i64: 128, 128>}, {transform_indices = @transform_5, window_bounds = array<i64: 128, 128>}]} {
    %c0 = arith.constant 0 : index
    %c0_0 = arith.constant 0 : index
    %0 = vector.load %arg1[%c0, %c0_0] : memref<128x128xbf16, #tpu.memory_space<vmem>>, vector<128x128xbf16>
    %c0_1 = arith.constant 0 : index
    %c0_2 = arith.constant 0 : index
    %1 = vector.load %arg2[%c0_1, %c0_2] : memref<128x256xbf16, #tpu.memory_space<vmem>>, vector<128x256xbf16>
    %cst = arith.constant dense<0.000000e+00> : vector<128x256xf32>
    %2 = tpu.matmul %0, %1, %cst {dimension_numbers = #tpu.dot_dimension_numbers<[1], [0], [0], [1], [0, 0, 1, 1], [], []>} : vector<128x128xbf16>, vector<128x256xbf16>, vector<128x256xf32> -> vector<128x256xf32>
    %3 = vector.extract_strided_slice %2 {offsets = [0, 0], sizes = [128, 128], strides = [1, 1]} : vector<128x256xf32> to vector<128x128xf32>
    %4 = vector.extract_strided_slice %2 {offsets = [0, 128], sizes = [128, 128], strides = [1, 1]} : vector<128x256xf32> to vector<128x128xf32>
    %5 = arith.mulf %3, %3 : vector<128x128xf32>
    %cst_3 = arith.constant dense<0.000000e+00> : vector<128xf32>
    %6 = vector.multi_reduction <add>, %5, %cst_3 [1] : vector<128x128xf32> to vector<128xf32>
    %7 = vector.shape_cast %6 : vector<128xf32> to vector<128x1xf32>
    %cst_4 = arith.constant 7.812500e-03 : f32
    %8 = vector.broadcast %cst_4 : f32 to vector<128x1xf32>
    %9 = arith.mulf %7, %8 : vector<128x1xf32>
    %cst_5 = arith.constant 9.99999997E-7 : f32
    %10 = vector.broadcast %cst_5 : f32 to vector<128x1xf32>
    %11 = arith.addf %9, %10 : vector<128x1xf32>
    %12 = math.rsqrt %11 : vector<128x1xf32>
    %13 = vector.broadcast %12 : vector<128x1xf32> to vector<128x128xf32>
    %14 = arith.mulf %3, %13 : vector<128x128xf32>
    %c0_6 = arith.constant 0 : index
    %c0_7 = arith.constant 0 : index
    %15 = vector.load %arg3[%c0_6, %c0_7] : memref<1x128xf32, #tpu.memory_space<vmem>>, vector<1x128xf32>
    %16 = vector.broadcast %15 : vector<1x128xf32> to vector<128x128xf32>
    %17 = arith.mulf %14, %16 : vector<128x128xf32>
    %18 = arith.truncf %17 : vector<128x128xf32> to vector<128x128xbf16>
    %c0_8 = arith.constant 0 : index
    %c0_9 = arith.constant 0 : index
    %19 = vector.load %arg4[%c0_8, %c0_9] : memref<128x128xbf16, #tpu.memory_space<vmem>>, vector<128x128xbf16>
    %cst_10 = arith.constant dense<0.000000e+00> : vector<128x128xf32>
    %20 = tpu.matmul %18, %19, %cst_10 {dimension_numbers = #tpu.dot_dimension_numbers<[1], [0], [0], [1], [0, 0, 1, 1], [], []>} : vector<128x128xbf16>, vector<128x128xbf16>, vector<128x128xf32> -> vector<128x128xf32>
    %21 = arith.negf %4 : vector<128x128xf32>
    %22 = math.exp %21 : vector<128x128xf32>
    %cst_11 = arith.constant 1.000000e+00 : f32
    %23 = vector.broadcast %cst_11 : f32 to vector<128x128xf32>
    %24 = arith.addf %23, %22 : vector<128x128xf32>
    %25 = arith.divf %23, %24 : vector<128x128xf32>
    %26 = arith.mulf %4, %25 : vector<128x128xf32>
    %27 = arith.mulf %26, %20 : vector<128x128xf32>
    %28 = arith.truncf %27 : vector<128x128xf32> to vector<128x128xbf16>
    %c0_12 = arith.constant 0 : index
    %c0_13 = arith.constant 0 : index
    %29 = vector.load %arg5[%c0_12, %c0_13] : memref<128x128xbf16, #tpu.memory_space<vmem>>, vector<128x128xbf16>
    %cst_14 = arith.constant dense<0.000000e+00> : vector<128x128xf32>
    %30 = tpu.matmul %28, %29, %cst_14 {dimension_numbers = #tpu.dot_dimension_numbers<[1], [0], [0], [1], [0, 0, 1, 1], [], []>} : vector<128x128xbf16>, vector<128x128xbf16>, vector<128x128xf32> -> vector<128x128xf32>
    %31 = arith.truncf %30 : vector<128x128xf32> to vector<128x128xbf16>
    %c0_15 = arith.constant 0 : index
    %c0_16 = arith.constant 0 : index
    %32 = vector.load %arg6[%c0_15, %c0_16] : memref<128x128xbf16, #tpu.memory_space<vmem>>, vector<128x128xbf16>
    tpu.vector_store %arg6[%c0_15, %c0_16], %31 {strides = array<i32>} : memref<128x128xbf16, #tpu.memory_space<vmem>>, vector<128x128xbf16>,
    return
  }
  func.func @transform_0(%arg0: i32) -> (i32, i32) {
    %c0_i32 = arith.constant 0 : i32
    %c0_i32_0 = arith.constant 0 : i32
    return %arg0, %c0_i32 : i32, i32
  }
  func.func @transform_1(%arg0: i32) -> (i32, i32) {
    %c0_i32 = arith.constant 0 : i32
    %c0_i32_0 = arith.constant 0 : i32
    %c0_i32_1 = arith.constant 0 : i32
    return %c0_i32, %c0_i32_0 : i32, i32
  }
  func.func @transform_2(%arg0: i32) -> (i32, i32) {
    %c0_i32 = arith.constant 0 : i32
    %c0_i32_0 = arith.constant 0 : i32
    %c0_i32_1 = arith.constant 0 : i32
    return %c0_i32, %c0_i32_0 : i32, i32
  }
  func.func @transform_3(%arg0: i32) -> (i32, i32) {
    %c0_i32 = arith.constant 0 : i32
    %c0_i32_0 = arith.constant 0 : i32
    %c0_i32_1 = arith.constant 0 : i32
    return %c0_i32, %c0_i32_0 : i32, i32
  }
  func.func @transform_4(%arg0: i32) -> (i32, i32) {
    %c0_i32 = arith.constant 0 : i32
    %c0_i32_0 = arith.constant 0 : i32
    %c0_i32_1 = arith.constant 0 : i32
    return %c0_i32, %c0_i32_0 : i32, i32
  }
  func.func @transform_5(%arg0: i32) -> (i32, i32) {
    %c0_i32 = arith.constant 0 : i32
    %c0_i32_0 = arith.constant 0 : i32
    return %arg0, %c0_i32 : i32, i32
  }
}

module attributes {stable_mosaic.version = 11 : i64} {
  func.func @_xglu_resident_kernel(%arg0: i32, %arg1: memref<128x128xbf16, #tpu.memory_space<vmem>>, %arg2: memref<128x256xbf16, #tpu.memory_space<vmem>>, %arg3: memref<1x128xf32, #tpu.memory_space<vmem>>, %arg4: memref<128x128xbf16, #tpu.memory_space<vmem>>, %arg5: memref<128x128xbf16, #tpu.memory_space<vmem>>, %arg6: memref<128x128xbf16, #tpu.memory_space<vmem>>) attributes {dimension_semantics = [#tpu.dimension_semantics<parallel>], iteration_bounds = array<i64: 1>, scalar_prefetch = 0 : i64, scratch_operands = 0 : i64, tpu.core_type = #tpu.core_type<tc>, window_params = [{transform_indices = @transform_0, window_bounds = array<i64: 128, 128>}, {pipeline_mode = #tpu.pipeline_mode<synchronous>, transform_indices = @transform_1, window_bounds = array<i64: 128, 256>}, {pipeline_mode = #tpu.pipeline_mode<synchronous>, transform_indices = @transform_2, window_bounds = array<i64: 1, 128>}, {pipeline_mode = #tpu.pipeline_mode<synchronous>, transform_indices = @transform_3, window_bounds = array<i64: 128, 128>}, {pipeline_mode = #tpu.pipeline_mode<synchronous>, transform_indices = @transform_4, window_bounds = array<i64: 128, 128>}, {transform_indices = @transform_5, window_bounds = array<i64: 128, 128>}]} {
    %c0 = arith.constant 0 : index
    %c0_0 = arith.constant 0 : index
    %0 = vector.load %arg1[%c0, %c0_0] : memref<128x128xbf16, #tpu.memory_space<vmem>>, vector<128x128xbf16>
    %c0_1 = arith.constant 0 : index
    %c0_2 = arith.constant 0 : index
    %1 = vector.load %arg2[%c0_1, %c0_2] : memref<128x256xbf16, #tpu.memory_space<vmem>>, vector<128x256xbf16>
    %cst = arith.constant dense<0.000000e+00> : vector<128x256xf32>
    %2 = tpu.matmul %0, %1, %cst {dimension_numbers = #tpu.dot_dimension_numbers<[1], [0], [0], [1], [0, 0, 1, 1], [], []>} : vector<128x128xbf16>, vector<128x256xbf16>, vector<128x256xf32> -> vector<128x256xf32>
    %3 = vector.extract_strided_slice %2 {offsets = [0, 0], sizes = [128, 128], strides = [1, 1]} : vector<128x256xf32> to vector<128x128xf32>
    %4 = vector.extract_strided_slice %2 {offsets = [0, 128], sizes = [128, 128], strides = [1, 1]} : vector<128x256xf32> to vector<128x128xf32>
    %5 = arith.mulf %3, %3 : vector<128x128xf32>
    %cst_3 = arith.constant dense<0.000000e+00> : vector<128xf32>
    %6 = vector.multi_reduction <add>, %5, %cst_3 [1] : vector<128x128xf32> to vector<128xf32>
    %7 = vector.shape_cast %6 : vector<128xf32> to vector<128x1xf32>
    %cst_4 = arith.constant 7.812500e-03 : f32
    %8 = vector.broadcast %cst_4 : f32 to vector<128x1xf32>
    %9 = arith.mulf %7, %8 : vector<128x1xf32>
    %cst_5 = arith.constant 9.99999997E-7 : f32
    %10 = vector.broadcast %cst_5 : f32 to vector<128x1xf32>
    %11 = arith.addf %9, %10 : vector<128x1xf32>
    %12 = math.rsqrt %11 : vector<128x1xf32>
    %13 = vector.broadcast %12 : vector<128x1xf32> to vector<128x128xf32>
    %14 = arith.mulf %3, %13 : vector<128x128xf32>
    %c0_6 = arith.constant 0 : index
    %c0_7 = arith.constant 0 : index
    %15 = vector.load %arg3[%c0_6, %c0_7] : memref<1x128xf32, #tpu.memory_space<vmem>>, vector<1x128xf32>
    %16 = vector.broadcast %15 : vector<1x128xf32> to vector<128x128xf32>
    %17 = arith.mulf %14, %16 : vector<128x128xf32>
    %18 = arith.truncf %17 : vector<128x128xf32> to vector<128x128xbf16>
    %c0_8 = arith.constant 0 : index
    %c0_9 = arith.constant 0 : index
    %19 = vector.load %arg4[%c0_8, %c0_9] : memref<128x128xbf16, #tpu.memory_space<vmem>>, vector<128x128xbf16>
    %cst_10 = arith.constant dense<0.000000e+00> : vector<128x128xf32>
    %20 = tpu.matmul %18, %19, %cst_10 {dimension_numbers = #tpu.dot_dimension_numbers<[1], [0], [0], [1], [0, 0, 1, 1], [], []>} : vector<128x128xbf16>, vector<128x128xbf16>, vector<128x128xf32> -> vector<128x128xf32>
    %21 = arith.negf %4 : vector<128x128xf32>
    %22 = math.exp %21 : vector<128x128xf32>
    %cst_11 = arith.constant 1.000000e+00 : f32
    %23 = vector.broadcast %cst_11 : f32 to vector<128x128xf32>
    %24 = arith.addf %23, %22 : vector<128x128xf32>
    %25 = arith.divf %23, %24 : vector<128x128xf32>
    %26 = arith.mulf %4, %25 : vector<128x128xf32>
    %27 = arith.mulf %26, %20 : vector<128x128xf32>
    %28 = arith.truncf %27 : vector<128x128xf32> to vector<128x128xbf16>
    %c0_12 = arith.constant 0 : index
    %c0_13 = arith.constant 0 : index
    %29 = vector.load %arg5[%c0_12, %c0_13] : memref<128x128xbf16, #tpu.memory_space<vmem>>, vector<128x128xbf16>
    %cst_14 = arith.constant dense<0.000000e+00> : vector<128x128xf32>
    %30 = tpu.matmul %28, %29, %cst_14 {dimension_numbers = #tpu.dot_dimension_numbers<[1], [0], [0], [1], [0, 0, 1, 1], [], []>} : vector<128x128xbf16>, vector<128x128xbf16>, vector<128x128xf32> -> vector<128x128xf32>
    %31 = arith.truncf %30 : vector<128x128xf32> to vector<128x128xbf16>
    %c0_15 = arith.constant 0 : index
    %c0_16 = arith.constant 0 : index
    %32 = vector.load %arg6[%c0_15, %c0_16] : memref<128x128xbf16, #tpu.memory_space<vmem>>, vector<128x128xbf16>
    tpu.vector_store %arg6[%c0_15, %c0_16], %31 {strides = array<i32>} : memref<128x128xbf16, #tpu.memory_space<vmem>>, vector<128x128xbf16>,
    return
  }
  func.func @transform_0(%arg0: i32) -> (i32, i32) {
    %c0_i32 = arith.constant 0 : i32
    %c0_i32_0 = arith.constant 0 : i32
    return %arg0, %c0_i32 : i32, i32
  }
  func.func @transform_1(%arg0: i32) -> (i32, i32) {
    %c0_i32 = arith.constant 0 : i32
    %c0_i32_0 = arith.constant 0 : i32
    %c0_i32_1 = arith.constant 0 : i32
    return %c0_i32, %c0_i32_0 : i32, i32
  }
  func.func @transform_2(%arg0: i32) -> (i32, i32) {
    %c0_i32 = arith.constant 0 : i32
    %c0_i32_0 = arith.constant 0 : i32
    %c0_i32_1 = arith.constant 0 : i32
    return %c0_i32, %c0_i32_0 : i32, i32
  }
  func.func @transform_3(%arg0: i32) -> (i32, i32) {
    %c0_i32 = arith.constant 0 : i32
    %c0_i32_0 = arith.constant 0 : i32
    %c0_i32_1 = arith.constant 0 : i32
    return %c0_i32, %c0_i32_0 : i32, i32
  }
  func.func @transform_4(%arg0: i32) -> (i32, i32) {
    %c0_i32 = arith.constant 0 : i32
    %c0_i32_0 = arith.constant 0 : i32
    %c0_i32_1 = arith.constant 0 : i32
    return %c0_i32, %c0_i32_0 : i32, i32
  }
  func.func @transform_5(%arg0: i32) -> (i32, i32) {
    %c0_i32 = arith.constant 0 : i32
    %c0_i32_0 = arith.constant 0 : i32
    return %arg0, %c0_i32 : i32, i32
  }
}

</mosaic_0001>

<bundles_post_ra>
// kernel: tpu_custom_call.1
= control target key start
LH: loop header
LB: loop body
LE: loop exit
PB: predicated region body
PF: predicated region fallthrough
CT: control target
= control target key end

     0   :  { %10 = vsyncpa [#allocation3], 0  ;;  %s2233_s0 = inlined_call_operand.hbm [shape: bf16[128,128], index: 0, kind: input, shape index: {}]   ;;  %s2234_s1 = inlined_call_operand.hbm [shape: bf16[128,256], index: 1, kind: input, shape index: {}]   ;;  %s2235_s2 = inlined_call_operand.vmem [shape: f32[1,128], index: 2, kind: input, shape index: {}]   ;;  %s2236_s3 = inlined_call_operand.hbm [shape: bf16[128,128], index: 3, kind: input, shape index: {}]   ;;  %s2237_s4 = inlined_call_operand.hbm [shape: bf16[128,128], index: 4, kind: input, shape index: {}]   ;;  %s2238_s5 = inlined_call_operand.hbm [shape: bf16[128,128], index: 5, kind: output, shape index: {}]  }
   0x1   :  { %11 = vsyncpa [#allocation6], 0 }
   0x2   :  { %12 = vsyncpa [#allocation9], 0  ;;  %s31_s20 = sshll.u32 %s2234_s1, 4  ;;  %s32_s20 = int_to_ptr.hbm [resolvable:$true] %s31_s20 }
   0x3   :  { %13 = vsyncpa [#allocation4], 0  ;;  %s1746_s21 = smov [#allocation5]   ;;  %s18_s25 = sshll.u32 %s2233_s0, 4  ;;  %s19_s25 = int_to_ptr.hbm [resolvable:$true] %s18_s25 }
   0x4   :  { %s33_s22 = sshll.u32 %s1746_s21, 4  ;;  %s1747_s26 = smov 128   ;;  %s34_s22 = int_to_ptr.vmem [resolvable:$true] %s33_s22 }
   0x5   :  { %s1748_s27 = smov 8   ;;  %s1749_s28 = smov [#allocation2]  }
   0x6   :  { %39 = dma.hbm_to_vmem [thread:$0]  %s32_s20, 2048, %s34_s22, [#allocation6], %s1747_s26, %s1747_s26, %s1748_s27  }
   0x7   :  { %s20_s29 = sshll.u32 %s1749_s28, 4  ;;  %s1750_s30 = smov 64   ;;  %s21_s29 = int_to_ptr.vmem [resolvable:$true] %s20_s29 }
   0x8   :  { %s1751_s6 = smov 4   ;;  %s46_s8 = sshll.u32 %s2236_s3, 4  ;;  %s47_s8 = int_to_ptr.hbm [resolvable:$true] %s46_s8 }
   0x9   :  { %26 = dma.hbm_to_vmem [thread:$0]  %s19_s25, 1024, %s21_s29, [#allocation3], %s1750_s30, %s1750_s30, %s1751_s6  }
   0xa   :  { %s1752_s9 = smov [#allocation7]   ;;  %s59_s12 = sshll.u32 %s2237_s4, 4  ;;  %s60_s12 = int_to_ptr.hbm [resolvable:$true] %s59_s12 }
   0xb   :  { %s48_s0 = sshll.u32 %s1752_s9, 4  ;;  %s1753_s13 = smov [#allocation8]   ;;  %s49_s0 = int_to_ptr.vmem [resolvable:$true] %s48_s0 }
   0xc   :  { %54 = dma.hbm_to_vmem [thread:$0]  %s47_s8, 1024, %s49_s0, [#allocation6], %s1750_s30, %s1750_s30, %s1751_s6  }
   0xd   :  { %s61_s14 = sshll.u32 %s1753_s13, 4  ;;  %s62_s14 = int_to_ptr.vmem [resolvable:$true] %s61_s14 }
   0xe   :  { %67 = dma.hbm_to_vmem [thread:$0]  %s60_s12, 1024, %s62_s14, [#allocation9], %s1750_s30, %s1750_s30, %s1751_s6  }
   0xf   :  { %1738 = dma.done.wait [#allocation3], 1024  }
  0x10   :  { %1739 = vsyncadd [#allocation3], 4294966272 }
  0x11   :  { %1740 = dma.done.wait [#allocation6], 3072  }
  0x12   :  { %1741 = vsyncadd [#allocation6], 4294964224 }
  0x13   :  { %1742 = dma.done.wait [#allocation9], 1024  }
  0x14   :  { %1743 = vsyncadd [#allocation9], 4294966272  ;;  %v1339_v0 = vld [vmem:[#allocation5 + $0x70] sm:$0xf]  ;;  %v1448_v1 = vld [vmem:[#allocation5 + $0x74] sm:$0xf0] }
  0x15   :  { %v1331_v2 = vld [vmem:[#allocation5 + $0x60] sm:$0xf]  ;;  %v1340_v3 = vor.u32 %v1448_v1, %v1339_v0  ;;  %v1446_v4 = vld [vmem:[#allocation5 + $0x64] sm:$0xf0]  ;;  %v1323_v6 = vld [vmem:[#allocation5 + $0x50] sm:$0xf] }
  0x16   :  { %v1332_v5 = vor.u32 %v1446_v4, %v1331_v2  ;;  %v1444_v7 = vld [vmem:[#allocation5 + $0x54] sm:$0xf0]  ;;  %v1315_v9 = vld [vmem:[#allocation5 + $0x40] sm:$0xf]  ;;  %v1442_v10 = vld [vmem:[#allocation5 + $0x44] sm:$0xf0] }
  0x17   :  { %244 = vmatpush.bf16.msra.mxu0 %v1340_v3  ;;  %v1324_v8 = vor.u32 %v1444_v7, %v1323_v6  ;;  %v1316_v11 = vor.u32 %v1442_v10, %v1315_v9  ;;  %v1307_v12 = vld [vmem:[#allocation5 + $0x30] sm:$0xf]  ;;  %v1440_v13 = vld [vmem:[#allocation5 + $0x34] sm:$0xf0]  ;;  %v1299_v15 = vld [vmem:[#allocation5 + $0x20] sm:$0xf] }
  0x18   :  { %v1308_v14 = vor.u32 %v1440_v13, %v1307_v12  ;;  %v1438_v16 = vld [vmem:[#allocation5 + $0x24] sm:$0xf0]  ;;  %v1291_v18 = vld [vmem:[#allocation5 + $0x10] sm:$0xf]  ;;  %v1436_v19 = vld [vmem:[#allocation5 + $0x14] sm:$0xf0] }
  0x19   :  { %v1300_v17 = vor.u32 %v1438_v16, %v1299_v15  ;;  %v1292_v20 = vor.u32 %v1436_v19, %v1291_v18  ;;  %v1283_v21 = vld [vmem:[#allocation5] sm:$0xf]  ;;  %v1434_v22 = vld [vmem:[#allocation5 + $0x4] sm:$0xf0]  ;;  %v1812_v26 = vld [vmem:[#allocation2 + $0x10] sm:$0xff]  ;;  %s1234_s18 = sshll.u32 %s2238_s5, 4  ;;  %s1235_s18 = int_to_ptr.hbm [resolvable:$true] %s1234_s18 }
  0x1a   :  { %v1284_v23 = vor.u32 %v1434_v22, %v1283_v21  ;;  %v1806_v24 = vld [vmem:[#allocation2] sm:$0xff]  ;;  %v1809_v25 = vld [vmem:[#allocation2 + $0x8] sm:$0xff]  ;;  %v1815_v27 = vld [vmem:[#allocation2 + $0x18] sm:$0xff] }
  0x1b   :  { %245 = vmatpush.bf16.msra.mxu0 %v1332_v5  ;;  %v1818_v28 = vld [vmem:[#allocation2 + $0x20] sm:$0xff]  ;;  %v1821_v29 = vld [vmem:[#allocation2 + $0x28] sm:$0xff]  ;;  %v1824_v30 = vld [vmem:[#allocation2 + $0x30] sm:$0xff] }
  0x1c   :  { %v1827_v31 = vld [vmem:[#allocation2 + $0x38] sm:$0xff]  ;;  %v1447_v40 = vld [vmem:[#allocation5 + $0x74] sm:$0xf]  ;;  %v1445_v45 = vld [vmem:[#allocation5 + $0x64] sm:$0xf] }
  0x1d   :  { %v1341_v41 = vld [vmem:[#allocation5 + $0x78] sm:$0xf0]  ;;  %v1333_v46 = vld [vmem:[#allocation5 + $0x68] sm:$0xf0]  ;;  %v1443_v48 = vld [vmem:[#allocation5 + $0x54] sm:$0xf] }
  0x1e   :  { %v1344_v42 = vor.u32 %v1447_v40, %v1341_v41  ;;  %v1336_v47 = vor.u32 %v1445_v45, %v1333_v46  ;;  %v1325_v49 = vld [vmem:[#allocation5 + $0x58] sm:$0xf0]  ;;  %v1441_v53 = vld [vmem:[#allocation5 + $0x44] sm:$0xf]  ;;  %v1317_v54 = vld [vmem:[#allocation5 + $0x48] sm:$0xf0] }
  0x1f   :  { %246 = vmatpush.bf16.msra.mxu0 %v1324_v8  ;;  %v1328_v50 = vor.u32 %v1443_v48, %v1325_v49  ;;  %v1320_v55 = vor.u32 %v1441_v53, %v1317_v54  ;;  %v1439_v56 = vld [vmem:[#allocation5 + $0x34] sm:$0xf]  ;;  %v1309_v57 = vld [vmem:[#allocation5 + $0x38] sm:$0xf0]  ;;  %v1437_v61 = vld [vmem:[#allocation5 + $0x24] sm:$0xf] }
  0x20   :  { %293 = vmatpush.bf16.msra.mxu1 %v1344_v42  ;;  %v1312_v58 = vor.u32 %v1439_v56, %v1309_v57  ;;  %v1301_v62 = vld [vmem:[#allocation5 + $0x28] sm:$0xf0]  ;;  %v1435_v0 = vld [vmem:[#allocation5 + $0x14] sm:$0xf]  ;;  %v1293_v1 = vld [vmem:[#allocation5 + $0x18] sm:$0xf0] }
  0x21   :  { %v1304_v63 = vor.u32 %v1437_v61, %v1301_v62  ;;  %v1296_v2 = vor.u32 %v1435_v0, %v1293_v1  ;;  %v1433_v5 = vld [vmem:[#allocation5 + $0x4] sm:$0xf]  ;;  %v1285_v6 = vld [vmem:[#allocation5 + $0x8] sm:$0xf0]  ;;  %v1456_v16 = vld [vmem:[#allocation7 + $0x38] sm:$0xff] }
  0x22   :  { %v1288_v7 = vor.u32 %v1433_v5, %v1285_v6  ;;  %690 = vmatpush.bf16.msra.mxu2 %v1456_v16  ;;  %v1453_v21 = vld [vmem:[#allocation7 + $0x20] sm:$0xff] }
  0x23   :  { %247 = vmatpush.bf16.msra.mxu0 %v1316_v11 }
  0x24   :  { %294 = vmatpush.bf16.msra.mxu1 %v1336_v47 }
  0x27   :  { %248 = vmatpush.bf16.msra.mxu0 %v1308_v14 }
  0x28   :  { %295 = vmatpush.bf16.msra.mxu1 %v1328_v50 }
  0x2b   :  { %249 = vmatpush.bf16.msra.mxu0 %v1300_v17  ;;  %v1455_v17 = vld [vmem:[#allocation7 + $0x30] sm:$0xff] }
  0x2c   :  { %296 = vmatpush.bf16.msra.mxu1 %v1320_v55  ;;  %691 = vmatpush.bf16.msra.mxu2 %v1455_v17 }
  0x2f   :  { %250 = vmatpush.bf16.msra.mxu0 %v1292_v20  ;;  %v1454_v20 = vld [vmem:[#allocation7 + $0x28] sm:$0xff] }
  0x30   :  { %297 = vmatpush.bf16.msra.mxu1 %v1312_v58  ;;  %692 = vmatpush.bf16.msra.mxu2 %v1454_v20 }
  0x33   :  { %251 = vmatpush.bf16.msra.mxu0 %v1284_v23 }
  0x34   :  { %298 = vmatpush.bf16.msra.mxu1 %v1304_v63  ;;  %693 = vmatpush.bf16.msra.mxu2 %v1453_v21 }
  0x36   :  { %252 = vmatmul.bf16.vlgmr.msra.gmra.mxu0 %v1806_v24 }
  0x38   :  { %299 = vmatpush.bf16.msra.mxu1 %v1296_v2 }
  0x3c   :  { %300 = vmatpush.bf16.msra.mxu1 %v1288_v7  ;;  %v1904_v7 = vld [vmem:[%s2235_s2] ss:$0 sm:$0xff]  ;;  %s1754_s2 = smov [#allocation10]  }
  0x3d   :  { %s1232_s15 = sshll.u32 %s1754_s2, 4  ;;  %s1233_s15 = int_to_ptr.vmem [resolvable:$true] %s1232_s15 }
  0x3f   :  { %301 = vmatmul.bf16.vlgmr.msra.gmra.mxu1 %v1806_v24  ;;  %v1452_v24 = vld [vmem:[#allocation7 + $0x18] sm:$0xff] }
  0x40   :  { %694 = vmatpush.bf16.msra.mxu2 %v1452_v24 }
  0x46   :  { %257 = vmatmul.bf16.gmra.mxu0 %v1809_v25 }
  0x4f   :  { %306 = vmatmul.bf16.gmra.mxu1 %v1809_v25  ;;  %v1451_v25 = vld [vmem:[#allocation7 + $0x10] sm:$0xff] }
  0x50   :  { %695 = vmatpush.bf16.msra.mxu2 %v1451_v25 }
  0x56   :  { %262 = vmatmul.bf16.gmra.mxu0 %v1812_v26 }
  0x5f   :  { %311 = vmatmul.bf16.gmra.mxu1 %v1812_v26 }
  0x66   :  { %267 = vmatmul.bf16.gmra.mxu0 %v1815_v27 }
  0x6f   :  { %316 = vmatmul.bf16.gmra.mxu1 %v1815_v27 }
  0x76   :  { %272 = vmatmul.bf16.gmra.mxu0 %v1818_v28 }
  0x7f   :  { %321 = vmatmul.bf16.gmra.mxu1 %v1818_v28 }
  0x86   :  { %277 = vmatmul.bf16.gmra.mxu0 %v1821_v29 }
  0x8f   :  { %326 = vmatmul.bf16.gmra.mxu1 %v1821_v29 }
  0x96   :  { %282 = vmatmul.bf16.gmra.mxu0 %v1824_v30 }
  0x9f   :  { %331 = vmatmul.bf16.gmra.mxu1 %v1824_v30 }
  0xa6   :  { %287 = vmatmul.bf16.gmra.mxu0 %v1827_v31 }
  0xaf   :  { %336 = vmatmul.bf16.gmra.mxu1 %v1827_v31 }
  0xb3   :  { %v1830_v32 = vpop.f32.mrf.mxu0 }
  0xb4   :  { %v342_v33 = vmul.f32 %v1830_v32, %v1830_v32 }
  0xb6   :  { %358 = vadd.xlane.f32.xlu0 %v342_v33 }
  0xbb   :  { %v1834_v34 = vpop.f32.mrf.mxu0 }
  0xbc   :  { %v343_v35 = vmul.f32 %v1834_v34, %v1834_v34 }
  0xbe   :  { %360 = vadd.xlane.f32.xlu0 %v343_v35  ;;  %v1450_v35 = vld [vmem:[#allocation7 + $0x8] sm:$0xff] }
  0xbf   :  { %696 = vmatpush.bf16.msra.mxu2 %v1450_v35 }
  0xc3   :  { %v1838_v36 = vpop.f32.mrf.mxu0 }
  0xc4   :  { %v344_v37 = vmul.f32 %v1838_v36, %v1838_v36 }
  0xc6   :  { %362 = vadd.xlane.f32.xlu1 %v344_v37 }
  0xcb   :  { %v1842_v38 = vpop.f32.mrf.mxu0 }
  0xcc   :  { %v345_v39 = vmul.f32 %v1842_v38, %v1842_v38 }
  0xce   :  { %364 = vadd.xlane.f32.xlu1 %v345_v39  ;;  %v1449_v39 = vld [vmem:[#allocation7] sm:$0xff] }
  0xcf   :  { %697 = vmatpush.bf16.msra.mxu2 %v1449_v39 }
  0xd3   :  { %v1846_v43 = vpop.f32.mrf.mxu0 }
  0xd4   :  { %v346_v44 = vmul.f32 %v1846_v43, %v1846_v43 }
  0xd6   :  { %366 = vadd.xlane.f32.xlu2 %v346_v44 }
  0xdb   :  { %v1850_v51 = vpop.f32.mrf.mxu0 }
  0xdc   :  { %v347_v52 = vmul.f32 %v1850_v51, %v1850_v51 }
  0xde   :  { %368 = vadd.xlane.f32.xlu2 %v347_v52 }
  0xe3   :  { %v1854_v59 = vpop.f32.mrf.mxu0 }
  0xe4   :  { %v348_v60 = vmul.f32 %v1854_v59, %v1854_v59 }
  0xe6   :  { %370 = vadd.xlane.f32.xlu0 %v348_v60 }
  0xeb   :  { %v1858_v3 = vpop.f32.mrf.mxu0 }
  0xec   :  { %v349_v4 = vmul.f32 %v1858_v3, %v1858_v3 }
  0xee   :  { %372 = vadd.xlane.f32.xlu1 %v349_v4 }
  0xf3   :  { %v1863_v8 = vpop.f32.mrf.mxu0 }
  0xf4   :  { %v350_v9 = vmul.f32 %v1863_v8, %v1863_v8 }
  0xf6   :  { %374 = vadd.xlane.f32.xlu2 %v350_v9 }
  0xfb   :  { %v1867_v10 = vpop.f32.mrf.mxu0 }
  0xfc   :  { %v351_v11 = vmul.f32 %v1867_v10, %v1867_v10 }
  0xfe   :  { %376 = vadd.xlane.f32.xlu0 %v351_v11 }
 0x103   :  { %v1872_v12 = vpop.f32.mrf.mxu0 }
 0x104   :  { %v352_v13 = vmul.f32 %v1872_v12, %v1872_v12 }
 0x106   :  { %378 = vadd.xlane.f32.xlu1 %v352_v13 }
 0x10b   :  { %v1876_v14 = vpop.f32.mrf.mxu0 }
 0x10c   :  { %v353_v15 = vmul.f32 %v1876_v14, %v1876_v14 }
 0x10e   :  { %380 = vadd.xlane.f32.xlu2 %v353_v15 }
 0x113   :  { %v1881_v18 = vpop.f32.mrf.mxu0 }
 0x114   :  { %v354_v19 = vmul.f32 %v1881_v18, %v1881_v18 }
 0x116   :  { %382 = vadd.xlane.f32.xlu0 %v354_v19 }
 0x11b   :  { %v1885_v22 = vpop.f32.mrf.mxu0 }
 0x11c   :  { %v355_v23 = vmul.f32 %v1885_v22, %v1885_v22 }
 0x11e   :  { %384 = vadd.xlane.f32.xlu1 %v355_v23 }
 0x123   :  { %v1890_v26 = vpop.f32.mrf.mxu0 }
 0x124   :  { %v356_v33 = vmul.f32 %v1890_v26, %v1890_v26 }
 0x126   :  { %386 = vadd.xlane.f32.xlu2 %v356_v33 }
 0x129   :  { %v359_v37 = vpop.xlane.xlu0 %358 }
 0x12a   :  { %v390_v40 = vmul.f32 0.0078125, %v359_v37 }
 0x12b   :  { %v1894_v41 = vpop.f32.mrf.mxu0 }
 0x12c   :  { %v406_v42 = vadd.f32 1e-06, %v390_v40  ;;  %v357_v44 = vmul.f32 %v1894_v41, %v1894_v41 }
 0x12e   :  { %1522 = vrsqrt.f32 %v406_v42  ;;  %388 = vadd.xlane.f32.xlu0 %v357_v44  ;;  %vm428_vm1 = vweird.f32 %v406_v42 }
 0x131   :  { %v361_v27 = vpop.xlane.xlu0 %360 }
 0x132   :  { %v391_v45 = vmul.f32 0.0078125, %v361_v27 }
 0x134   :  { %v1523_v46 = vpop.eup %1522  ;;  %v407_v47 = vadd.f32 1e-06, %v391_v45 }
 0x135   :  { %v423_v48 = vmul.f32 %v1523_v46, %v406_v42  ;;  %vm429_vm0 = vweird.f32 %v1523_v46 }
 0x136   :  { %1524 = vrsqrt.f32 %v407_v47  ;;  %vm430_vm2 = vmor %vm428_vm1, %vm429_vm0  ;;  %vm438_vm4 = vweird.f32 %v407_v47 }
 0x137   :  { %v424_v49 = vmul.f32 %v1523_v46, %v423_v48 }
 0x139   :  { %v425_v50 = vmul.f32 0.5, %v424_v49  ;;  %v363_v52 = vpop.xlane.xlu1 %362 }
 0x13a   :  { %v392_v53 = vmul.f32 0.0078125, %v363_v52 }
 0x13b   :  { %v426_v54 = vsub.f32 1.5, %v425_v50 }
 0x13c   :  { %v1525_v55 = vpop.eup %1524  ;;  %v408_v56 = vadd.f32 1e-06, %v392_v53 }
 0x13d   :  { %v433_v57 = vmul.f32 %v1525_v55, %v407_v47  ;;  %v427_v58 = vmul.f32 %v1523_v46, %v426_v54  ;;  %vm439_vm3 = vweird.f32 %v1525_v55 }
 0x13e   :  { %1526 = vrsqrt.f32 %v408_v56  ;;  %vm440_vm5 = vmor %vm438_vm4, %vm439_vm3  ;;  %vm448_vm7 = vweird.f32 %v408_v56 }
 0x13f   :  { %v434_v60 = vmul.f32 %v1525_v55, %v433_v57  ;;  %v431_v0 = vsel %vm430_vm2, %v1523_v46, %v427_v58 }
 0x140   :  { %v582_v6 = vmul.f32 %v431_v0, %v1830_v32 }
 0x141   :  { %v435_v61 = vmul.f32 0.5, %v434_v60  ;;  %v365_v62 = vpop.xlane.xlu1 %364 }
 0x142   :  { %v393_v28 = vmul.f32 0.0078125, %v365_v62  ;;  %v602_v17 = vmul.f32 %v1904_v7, %v582_v6 }
 0x143   :  { %v436_v63 = vsub.f32 1.5, %v435_v61 }
 0x144   :  { %v1527_v1 = vpop.eup %1526  ;;  %v409_v2 = vadd.f32 1e-06, %v393_v28 }
 0x145   :  { %v437_v4 = vmul.f32 %v1525_v55, %v436_v63  ;;  %v443_v5 = vmul.f32 %v1527_v1, %v408_v56  ;;  %vm449_vm6 = vweird.f32 %v1527_v1 }
 0x146   :  { %1528 = vrsqrt.f32 %v409_v2  ;;  %vm450_vm8 = vmor %vm448_vm7, %vm449_vm6  ;;  %vm458_vm10 = vweird.f32 %v409_v2 }
 0x147   :  { %v444_v9 = vmul.f32 %v1527_v1, %v443_v5  ;;  %v441_v11 = vsel %vm440_vm5, %v1525_v55, %v437_v4 }
 0x148   :  { %v583_v29 = vmul.f32 %v441_v11, %v1834_v34 }
 0x149   :  { %v445_v13 = vmul.f32 0.5, %v444_v9  ;;  %v367_v15 = vpop.xlane.xlu2 %366 }
 0x14a   :  { %v394_v16 = vmul.f32 0.0078125, %v367_v15  ;;  %v603_v19 = vmul.f32 %v1904_v7, %v583_v29 }
 0x14b   :  { %v446_v20 = vsub.f32 1.5, %v445_v13 }
 0x14c   :  { %v1529_v21 = vpop.eup %1528  ;;  %v410_v23 = vadd.f32 1e-06, %v394_v16  ;;  %v618_v32 = vpack.c.bf16 %v603_v19, %v602_v17 }
 0x14d   :  { %v453_v24 = vmul.f32 %v1529_v21, %v409_v2  ;;  %v447_v25 = vmul.f32 %v1527_v1, %v446_v20  ;;  %vm459_vm9 = vweird.f32 %v1529_v21 }
 0x14e   :  { %1530 = vrsqrt.f32 %v410_v23  ;;  %698 = vmatmul.bf16.vlgmr.msra.gmra.mxu2 %v618_v32  ;;  %vm460_vm11 = vmor %vm458_vm10, %vm459_vm9  ;;  %vm468_vm13 = vweird.f32 %v410_v23 }
 0x14f   :  { %v454_v33 = vmul.f32 %v1529_v21, %v453_v24  ;;  %v451_v40 = vsel %vm450_vm8, %v1527_v1, %v447_v25 }
 0x150   :  { %v584_v46 = vmul.f32 %v451_v40, %v1838_v36 }
 0x151   :  { %v455_v35 = vmul.f32 0.5, %v454_v33  ;;  %v369_v34 = vpop.xlane.xlu2 %368 }
 0x152   :  { %v395_v37 = vmul.f32 0.0078125, %v369_v34  ;;  %v604_v30 = vmul.f32 %v1904_v7, %v584_v46 }
 0x153   :  { %v456_v39 = vsub.f32 1.5, %v455_v35 }
 0x154   :  { %v1531_v42 = vpop.eup %1530  ;;  %v411_v44 = vadd.f32 1e-06, %v395_v37 }
 0x155   :  { %v457_v27 = vmul.f32 %v1529_v21, %v456_v39  ;;  %v463_v45 = vmul.f32 %v1531_v42, %v410_v23  ;;  %vm469_vm12 = vweird.f32 %v1531_v42 }
 0x156   :  { %1532 = vrsqrt.f32 %v411_v44  ;;  %vm470_vm14 = vmor %vm468_vm13, %vm469_vm12  ;;  %vm478_vm0 = vweird.f32 %v411_v44 }
 0x157   :  { %v464_v47 = vmul.f32 %v1531_v42, %v463_v45  ;;  %v461_v48 = vsel %vm460_vm11, %v1529_v21, %v457_v27 }
 0x158   :  { %v585_v49 = vmul.f32 %v461_v48, %v1842_v38 }
 0x159   :  { %v465_v50 = vmul.f32 0.5, %v464_v47  ;;  %v371_v52 = vpop.xlane.xlu0 %370 }
 0x15a   :  { %v396_v53 = vmul.f32 0.0078125, %v371_v52  ;;  %v605_v54 = vmul.f32 %v1904_v7, %v585_v49 }
 0x15b   :  { %v466_v55 = vsub.f32 1.5, %v465_v50 }
 0x15c   :  { %v1533_v56 = vpop.eup %1532  ;;  %v412_v57 = vadd.f32 1e-06, %v396_v53  ;;  %v619_v58 = vpack.c.bf16 %v605_v54, %v604_v30 }
 0x15d   :  { %v473_v60 = vmul.f32 %v1533_v56, %v411_v44  ;;  %v467_v61 = vmul.f32 %v1531_v42, %v466_v55  ;;  %vm479_vm15 = vweird.f32 %v1533_v56 }
 0x15e   :  { %1534 = vrsqrt.f32 %v412_v57  ;;  %703 = vmatmul.bf16.gmra.mxu2 %v619_v58  ;;  %vm480_vm1 = vmor %vm478_vm0, %vm479_vm15  ;;  %vm488_vm3 = vweird.f32 %v412_v57  ;;  %v1923_v58 = vpop.f32.mrf.mxu1 }
 0x15f   :  { %v474_v36 = vmul.f32 %v1533_v56, %v473_v60  ;;  %v471_v0 = vsel %vm470_vm14, %v1531_v42, %v467_v61 }
 0x160   :  { %v586_v6 = vmul.f32 %v471_v0, %v1846_v43 }
 0x161   :  { %v475_v62 = vmul.f32 0.5, %v474_v36  ;;  %v373_v38 = vpop.xlane.xlu1 %372 }
 0x162   :  { %v397_v28 = vmul.f32 0.0078125, %v373_v38  ;;  %v606_v31 = vmul.f32 %v1904_v7, %v586_v6 }
 0x163   :  { %v476_v63 = vsub.f32 1.5, %v475_v62 }
 0x164   :  { %v1535_v1 = vpop.eup %1534  ;;  %v413_v2 = vadd.f32 1e-06, %v397_v28 }
 0x165   :  { %v477_v4 = vmul.f32 %v1533_v56, %v476_v63  ;;  %v483_v5 = vmul.f32 %v1535_v1, %v412_v57  ;;  %vm489_vm2 = vweird.f32 %v1535_v1 }
 0x166   :  { %1536 = vrsqrt.f32 %v413_v2  ;;  %vm490_vm4 = vmor %vm488_vm3, %vm489_vm2  ;;  %vm498_vm6 = vweird.f32 %v413_v2 }
 0x167   :  { %v484_v9 = vmul.f32 %v1535_v1, %v483_v5  ;;  %v481_v11 = vsel %vm480_vm1, %v1533_v56, %v477_v4 }
 0x168   :  { %v587_v29 = vmul.f32 %v481_v11, %v1850_v51  ;;  %v1927_v11 = vpop.f32.mrf.mxu1 }
 0x169   :  { %v485_v13 = vmul.f32 0.5, %v484_v9  ;;  %v375_v15 = vpop.xlane.xlu2 %374 }
 0x16a   :  { %v398_v16 = vmul.f32 0.0078125, %v375_v15  ;;  %v607_v17 = vmul.f32 %v1904_v7, %v587_v29 }
 0x16b   :  { %v486_v19 = vsub.f32 1.5, %v485_v13 }
 0x16c   :  { %v1537_v20 = vpop.eup %1536  ;;  %v414_v21 = vadd.f32 1e-06, %v398_v16  ;;  %v620_v23 = vpack.c.bf16 %v607_v17, %v606_v31 }
 0x16d   :  { %v493_v32 = vmul.f32 %v1537_v20, %v413_v2  ;;  %v487_v24 = vmul.f32 %v1535_v1, %v486_v19  ;;  %vm499_vm5 = vweird.f32 %v1537_v20 }
 0x16e   :  { %1538 = vrsqrt.f32 %v414_v21  ;;  %708 = vmatmul.bf16.gmra.mxu2 %v620_v23  ;;  %vm500_vm7 = vmor %vm498_vm6, %vm499_vm5  ;;  %vm508_vm9 = vweird.f32 %v414_v21 }
 0x16f   :  { %v494_v43 = vmul.f32 %v1537_v20, %v493_v32  ;;  %v491_v34 = vsel %vm490_vm4, %v1535_v1, %v487_v24 }
 0x170   :  { %v588_v44 = vmul.f32 %v491_v34, %v1854_v59 }
 0x171   :  { %v495_v25 = vmul.f32 0.5, %v494_v43  ;;  %v377_v51 = vpop.xlane.xlu0 %376 }
 0x172   :  { %v399_v33 = vmul.f32 0.0078125, %v377_v51  ;;  %v608_v50 = vmul.f32 %v1904_v7, %v588_v44 }
 0x173   :  { %v496_v35 = vsub.f32 1.5, %v495_v25  ;;  %v1931_v25 = vpop.f32.mrf.mxu1 }
 0x174   :  { %v1539_v37 = vpop.eup %1538  ;;  %v415_v39 = vadd.f32 1e-06, %v399_v33 }
 0x175   :  { %v497_v40 = vmul.f32 %v1537_v20, %v496_v35  ;;  %v503_v42 = vmul.f32 %v1539_v37, %v414_v21  ;;  %vm509_vm8 = vweird.f32 %v1539_v37 }
 0x176   :  { %1540 = vrsqrt.f32 %v415_v39  ;;  %vm510_vm10 = vmor %vm508_vm9, %vm509_vm8  ;;  %vm518_vm12 = vweird.f32 %v415_v39 }
 0x177   :  { %v504_v27 = vmul.f32 %v1539_v37, %v503_v42  ;;  %v501_v45 = vsel %vm500_vm7, %v1537_v20, %v497_v40 }
 0x178   :  { %v589_v46 = vmul.f32 %v501_v45, %v1858_v3 }
 0x179   :  { %v505_v47 = vmul.f32 0.5, %v504_v27  ;;  %v379_v48 = vpop.xlane.xlu1 %378 }
 0x17a   :  { %v400_v49 = vmul.f32 0.0078125, %v379_v48  ;;  %v609_v52 = vmul.f32 %v1904_v7, %v589_v46 }
 0x17b   :  { %v506_v53 = vsub.f32 1.5, %v505_v47 }
 0x17c   :  { %v1541_v30 = vpop.eup %1540  ;;  %v416_v54 = vadd.f32 1e-06, %v400_v49  ;;  %v621_v55 = vpack.c.bf16 %v609_v52, %v608_v50 }
 0x17d   :  { %v513_v56 = vmul.f32 %v1541_v30, %v415_v39  ;;  %v507_v57 = vmul.f32 %v1539_v37, %v506_v53  ;;  %vm519_vm11 = vweird.f32 %v1541_v30 }
 0x17e   :  { %1542 = vrsqrt.f32 %v416_v54  ;;  %713 = vmatmul.bf16.gmra.mxu2 %v621_v55  ;;  %vm520_vm13 = vmor %vm518_vm12, %vm519_vm11  ;;  %vm528_vm15 = vweird.f32 %v416_v54  ;;  %v1463_v55 = vld [vmem:[#allocation8 + $0x30] sm:$0xff] }
 0x17f   :  { %v514_v59 = vmul.f32 %v1541_v30, %v513_v56  ;;  %v511_v62 = vsel %vm510_vm10, %v1539_v37, %v507_v57 }
 0x180   :  { %v590_v1 = vmul.f32 %v511_v62, %v1863_v8 }
 0x181   :  { %v515_v3 = vmul.f32 0.5, %v514_v59  ;;  %v381_v60 = vpop.xlane.xlu2 %380 }
 0x182   :  { %v401_v61 = vmul.f32 0.0078125, %v381_v60  ;;  %v610_v13 = vmul.f32 %v1904_v7, %v590_v1 }
 0x183   :  { %v516_v36 = vsub.f32 1.5, %v515_v3 }
 0x184   :  { %v1543_v38 = vpop.eup %1542  ;;  %v417_v28 = vadd.f32 1e-06, %v401_v61 }
 0x185   :  { %v517_v63 = vmul.f32 %v1541_v30, %v516_v36  ;;  %v523_v0 = vmul.f32 %v1543_v38, %v416_v54  ;;  %vm529_vm14 = vweird.f32 %v1543_v38  ;;  %v1464_v54 = vld [vmem:[#allocation8 + $0x38] sm:$0xff] }
 0x186   :  { %1544 = vrsqrt.f32 %v417_v28  ;;  %vm530_vm0 = vmor %vm528_vm15, %vm529_vm14  ;;  %vm538_vm2 = vweird.f32 %v417_v28  ;;  %1147 = vmatpush.bf16.msra.mxu3 %v1464_v54 }
 0x187   :  { %v524_v2 = vmul.f32 %v1543_v38, %v523_v0  ;;  %v521_v4 = vsel %vm520_vm13, %v1541_v30, %v517_v63  ;;  %v1937_v30 = vpop.f32.mrf.mxu1  ;;  %v1377_v0 = vmul.f32 -1.442695, %v1923_v58 }
 0x188   :  { %v591_v5 = vmul.f32 %v521_v4, %v1867_v10 }
 0x189   :  { %v525_v6 = vmul.f32 0.5, %v524_v2  ;;  %v383_v9 = vpop.xlane.xlu0 %382 }
 0x18a   :  { %v402_v29 = vmul.f32 0.0078125, %v383_v9  ;;  %v611_v15 = vmul.f32 %v1904_v7, %v591_v5  ;;  %1148 = vmatpush.bf16.msra.mxu3 %v1463_v55  ;;  %v1378_v5 = vmul.f32 -1.442695, %v1927_v11 }
 0x18b   :  { %v526_v16 = vsub.f32 1.5, %v525_v6 }
 0x18c   :  { %v1545_v31 = vpop.eup %1544  ;;  %v418_v17 = vadd.f32 1e-06, %v402_v29  ;;  %v622_v19 = vpack.c.bf16 %v611_v15, %v610_v13  ;;  %v1461_v29 = vld [vmem:[#allocation8 + $0x20] sm:$0xff] }
 0x18d   :  { %v533_v20 = vmul.f32 %v1545_v31, %v417_v28  ;;  %v527_v8 = vmul.f32 %v1543_v38, %v526_v16  ;;  %vm539_vm1 = vweird.f32 %v1545_v31  ;;  %v1462_v28 = vld [vmem:[#allocation8 + $0x28] sm:$0xff] }
 0x18e   :  { %1546 = vrsqrt.f32 %v418_v17  ;;  %718 = vmatmul.bf16.gmra.mxu2 %v622_v19  ;;  %vm540_vm3 = vmor %vm538_vm2, %vm539_vm1  ;;  %vm548_vm5 = vweird.f32 %v418_v17  ;;  %1149 = vmatpush.bf16.msra.mxu3 %v1462_v28  ;;  %v1460_v19 = vld [vmem:[#allocation8 + $0x18] sm:$0xff] }
 0x18f   :  { %v534_v21 = vmul.f32 %v1545_v31, %v533_v20  ;;  %v531_v43 = vsel %vm530_vm0, %v1543_v38, %v527_v8  ;;  %v1941_v4 = vpop.f32.mrf.mxu1 }
 0x190   :  { %v592_v37 = vmul.f32 %v531_v43, %v1872_v12 }
 0x191   :  { %v535_v10 = vmul.f32 0.5, %v534_v21  ;;  %v385_v23 = vpop.xlane.xlu1 %384 }
 0x192   :  { %v403_v32 = vmul.f32 0.0078125, %v385_v23  ;;  %v612_v46 = vmul.f32 %v1904_v7, %v592_v37  ;;  %1150 = vmatpush.bf16.msra.mxu3 %v1461_v29  ;;  %v1459_v23 = vld [vmem:[#allocation8 + $0x10] sm:$0xff] }
 0x193   :  { %v536_v24 = vsub.f32 1.5, %v535_v10 }
 0x194   :  { %v1547_v51 = vpop.eup %1546  ;;  %v419_v33 = vadd.f32 1e-06, %v403_v32 }
 0x195   :  { %v537_v35 = vmul.f32 %v1545_v31, %v536_v24  ;;  %v543_v34 = vmul.f32 %v1547_v51, %v418_v17  ;;  %vm549_vm4 = vweird.f32 %v1547_v51 }
 0x196   :  { %1548 = vrsqrt.f32 %v419_v33  ;;  %vm550_vm6 = vmor %vm548_vm5, %vm549_vm4  ;;  %vm558_vm8 = vweird.f32 %v419_v33  ;;  %1151 = vmatpush.bf16.msra.mxu3 %v1460_v19 }
 0x197   :  { %v544_v39 = vmul.f32 %v1547_v51, %v543_v34  ;;  %v541_v40 = vsel %vm540_vm3, %v1545_v31, %v537_v35  ;;  %v1947_v10 = vpop.f32.mrf.mxu1  ;;  %v1458_v34 = vld [vmem:[#allocation8 + $0x8] sm:$0xff] }
 0x198   :  { %v593_v42 = vmul.f32 %v541_v40, %v1876_v14 }
 0x199   :  { %v545_v44 = vmul.f32 0.5, %v544_v39  ;;  %v387_v27 = vpop.xlane.xlu2 %386  ;;  %v1379_v39 = vmul.f32 -1.442695, %v1931_v25 }
 0x19a   :  { %v404_v45 = vmul.f32 0.0078125, %v387_v27  ;;  %v613_v47 = vmul.f32 %v1904_v7, %v593_v42  ;;  %1152 = vmatpush.bf16.msra.mxu3 %v1459_v23  ;;  %v1380_v42 = vmul.f32 -1.442695, %v1937_v30  ;;  %v1457_v27 = vld [vmem:[#allocation8] sm:$0xff] }
 0x19b   :  { %v546_v48 = vsub.f32 1.5, %v545_v44 }
 0x19c   :  { %v1549_v49 = vpop.eup %1548  ;;  %v420_v50 = vadd.f32 1e-06, %v404_v45  ;;  %v623_v52 = vpack.c.bf16 %v613_v47, %v612_v46 }
 0x19d   :  { %v553_v53 = vmul.f32 %v1549_v49, %v419_v33  ;;  %v547_v12 = vmul.f32 %v1547_v51, %v546_v48  ;;  %vm559_vm7 = vweird.f32 %v1549_v49 }
 0x19e   :  { %1550 = vrsqrt.f32 %v420_v50  ;;  %723 = vmatmul.bf16.gmra.mxu2 %v623_v52  ;;  %vm560_vm9 = vmor %vm558_vm8, %vm559_vm7  ;;  %vm568_vm11 = vweird.f32 %v420_v50  ;;  %1153 = vmatpush.bf16.msra.mxu3 %v1458_v34 }
 0x19f   :  { %v554_v14 = vmul.f32 %v1549_v49, %v553_v53  ;;  %v551_v60 = vsel %vm550_vm6, %v1547_v51, %v547_v12  ;;  %v1955_v47 = vpop.f32.mrf.mxu1 }
 0x1a0   :  { %v594_v63 = vmul.f32 %v551_v60, %v1881_v18 }
 0x1a1   :  { %v555_v56 = vmul.f32 0.5, %v554_v14  ;;  %v389_v57 = vpop.xlane.xlu0 %388 }
 0x1a2   :  { %v405_v59 = vmul.f32 0.0078125, %v389_v57  ;;  %v614_v13 = vmul.f32 %v1904_v7, %v594_v63  ;;  %1154 = vmatpush.bf16.msra.mxu3 %v1457_v27  ;;  %v1382_v57 = vmul.f32 -1.442695, %v1947_v10 }
 0x1a3   :  { %v556_v3 = vsub.f32 1.5, %v555_v56  ;;  %v1381_v56 = vmul.f32 -1.442695, %v1941_v4 }
 0x1a4   :  { %v1551_v61 = vpop.eup %1550  ;;  %v421_v36 = vadd.f32 1e-06, %v405_v59 }
 0x1a5   :  { %v557_v62 = vmul.f32 %v1549_v49, %v556_v3  ;;  %v563_v38 = vmul.f32 %v1551_v61, %v420_v50  ;;  %vm569_vm10 = vweird.f32 %v1551_v61 }
 0x1a6   :  { %1552 = vrsqrt.f32 %v421_v36  ;;  %vm570_vm12 = vmor %vm568_vm11, %vm569_vm10  ;;  %vm578_vm14 = vweird.f32 %v421_v36 }
 0x1a7   :  { %v564_v1 = vmul.f32 %v1551_v61, %v563_v38  ;;  %v561_v2 = vsel %vm560_vm9, %v1549_v49, %v557_v62  ;;  %1554 = vpow2.f32 %v1377_v0  ;;  %v1961_v14 = vpop.f32.mrf.mxu1 }
 0x1a8   :  { %v595_v6 = vmul.f32 %v561_v2, %v1885_v22  ;;  %1556 = vpow2.f32 %v1378_v5 }
 0x1a9   :  { %v565_v9 = vmul.f32 0.5, %v564_v1 }
 0x1aa   :  { %v615_v15 = vmul.f32 %v1904_v7, %v595_v6 }
 0x1ab   :  { %v566_v16 = vsub.f32 1.5, %v565_v9 }
 0x1ac   :  { %v1553_v18 = vpop.eup %1552  ;;  %v624_v31 = vpack.c.bf16 %v615_v15, %v614_v13 }
 0x1ad   :  { %v573_v17 = vmul.f32 %v1553_v18, %v421_v36  ;;  %v567_v20 = vmul.f32 %v1551_v61, %v566_v16  ;;  %v1555_v22 = vpop.eup %1554  ;;  %vm579_vm13 = vweird.f32 %v1553_v18 }
 0x1ae   :  { %728 = vmatmul.bf16.gmra.mxu2 %v624_v31  ;;  %v1557_v32 = vpop.eup %1556  ;;  %v787_v51 = vadd.f32 1.0, %v1555_v22  ;;  %vm580_vm15 = vmor %vm578_vm14, %vm579_vm13 }
 0x1af   :  { %v574_v8 = vmul.f32 %v1553_v18, %v573_v17  ;;  %v571_v43 = vsel %vm570_vm12, %v1551_v61, %v567_v20  ;;  %v788_v33 = vadd.f32 1.0, %v1557_v32  ;;  %v1979_v5 = vpop.f32.mrf.mxu1  ;;  %v1383_v32 = vmul.f32 -1.442695, %v1955_v47 }
 0x1b0   :  { %v596_v37 = vmul.f32 %v571_v43, %v1890_v26  ;;  %1558 = vrcp.f32 %v787_v51  ;;  %vm808_vm0 = vweird.f32 %v787_v51  ;;  %v812_v60 = vand.u32 2147483647, %v787_v51 }
 0x1b1   :  { %v575_v21 = vmul.f32 0.5, %v574_v8  ;;  %1560 = vrcp.f32 %v788_v33  ;;  %vm823_vm2 = vweird.f32 %v788_v33  ;;  %v814_v61 = vand.u32 2147483648, %v787_v51 }
 0x1b2   :  { %v616_v45 = vmul.f32 %v1904_v7, %v596_v37  ;;  %1562 = vpow2.f32 %v1379_v39  ;;  %v827_v36 = vand.u32 2147483647, %v788_v33  ;;  %v829_v62 = vand.u32 2147483648, %v788_v33 }
 0x1b3   :  { %v576_v24 = vsub.f32 1.5, %v575_v21  ;;  %1564 = vpow2.f32 %v1380_v42  ;;  %vm813_vm6 = vcmp.eq.f32.partialorder %v812_v60, 8.507059e+37  ;;  %v815_v9 = vor.u32 1.1754944e-38, %v814_v61 }
 0x1b4   :  { %vm828_vm7 = vcmp.eq.f32.partialorder %v827_v36, 8.507059e+37  ;;  %v830_v29 = vor.u32 1.1754944e-38, %v829_v62 }
 0x1b5   :  { %v577_v35 = vmul.f32 %v1553_v18, %v576_v24 }
 0x1b6   :  { %v1559_v48 = vpop.eup %1558 }
 0x1b7   :  { %v581_v40 = vsel %vm580_vm15, %v1553_v18, %v577_v35  ;;  %v1561_v49 = vpop.eup %1560  ;;  %v804_v53 = vmul.f32 %v1559_v48, %v787_v51  ;;  %vm809_vm1 = vweird.f32 %v1559_v48  ;;  %v1384_v51 = vmul.f32 -1.442695, %v1961_v14 }
 0x1b8   :  { %v597_v44 = vmul.f32 %v581_v40, %v1894_v41  ;;  %v1563_v50 = vpop.eup %1562  ;;  %v819_v54 = vmul.f32 %v1561_v49, %v788_v33  ;;  %vm824_vm3 = vweird.f32 %v1561_v49  ;;  %vm1969_vm4 = vmor %vm808_vm0, %vm809_vm1  ;;  %v1999_v33 = vpop.f32.mrf.mxu1 }
 0x1b9   :  { %v1565_v52 = vpop.eup %1564  ;;  %v1957_v41 = vadd.f32 1.0, %v1563_v50  ;;  %vm1975_vm5 = vmor %vm823_vm2, %vm824_vm3 }
 0x1ba   :  { %v617_v46 = vmul.f32 %v1904_v7, %v597_v44  ;;  %v1959_v12 = vadd.f32 1.0, %v1565_v52  ;;  %v805_v7 = vsub.f32 1.0, %v804_v53  ;;  %v820_v55 = vsub.f32 1.0, %v819_v54 }
 0x1bb   :  { %1566 = vrcp.f32 %v1957_v41  ;;  %vm838_vm8 = vweird.f32 %v1957_v41  ;;  %v844_v42 = vand.u32 2147483648, %v1957_v41 }
 0x1bc   :  { %v625_v26 = vpack.c.bf16 %v617_v46, %v616_v45  ;;  %1568 = vrcp.f32 %v1959_v12  ;;  %v806_v59 = vmul.f32 %v1559_v48, %v805_v7  ;;  %v821_v3 = vmul.f32 %v1561_v49, %v820_v55 }
 0x1bd   :  { %1570 = vpow2.f32 %v1381_v56  ;;  %vm853_vm10 = vweird.f32 %v1959_v12  ;;  %v857_v44 = vand.u32 2147483647, %v1959_v12  ;;  %v859_v27 = vand.u32 2147483648, %v1959_v12 }
 0x1be   :  { %733 = vmatmul.bf16.gmra.mxu2 %v625_v26  ;;  %1572 = vpow2.f32 %v1382_v57  ;;  %v807_v28 = vadd.f32 %v1559_v48, %v806_v59  ;;  %v822_v0 = vadd.f32 %v1561_v49, %v821_v3  ;;  %v845_v53 = vor.u32 1.1754944e-38, %v844_v42 }
 0x1bf   :  { %vm858_vm15 = vcmp.eq.f32.partialorder %v857_v44, 8.507059e+37  ;;  %v860_v54 = vor.u32 1.1754944e-38, %v859_v27 }
 0x1c0   :  { %v811_v16 = vsel %vm1969_vm4, %v1559_v48, %v807_v28  ;;  %v826_v18 = vsel %vm1975_vm5, %v1561_v49, %v822_v0  ;;  %v2035_v59 = vpop.f32.mrf.mxu1  ;;  %v1385_v28 = vmul.f32 -1.442695, %v1979_v5 }
 0x1c1   :  { %v1967_v38 = vpop.eup %1566  ;;  %v816_v20 = vsel %vm813_vm6, %v815_v9, %v811_v16  ;;  %v831_v8 = vsel %vm828_vm7, %v830_v29, %v826_v18  ;;  %v1387_v27 = vmul.f32 -1.442695, %v2035_v59 }
 0x1c2   :  { %v1973_v1 = vpop.eup %1568  ;;  %v834_v31 = vmul.f32 %v1967_v38, %v1957_v41  ;;  %v1043_v24 = vmul.f32 %v816_v20, %v1923_v58  ;;  %v1044_v43 = vmul.f32 %v831_v8, %v1927_v11  ;;  %vm839_vm9 = vweird.f32 %v1967_v38 }
 0x1c3   :  { %v1571_v6 = vpop.eup %1570  ;;  %v849_v17 = vmul.f32 %v1973_v1, %v1959_v12  ;;  %vm854_vm11 = vweird.f32 %v1973_v1  ;;  %v842_v11 = vand.u32 2147483647, %v1957_v41  ;;  %vm2014_vm12 = vmor %vm838_vm8, %vm839_vm9 }
 0x1c4   :  { %v1573_v15 = vpop.eup %1572  ;;  %v1989_v19 = vadd.f32 1.0, %v1571_v6  ;;  %v835_v21 = vsub.f32 1.0, %v834_v31  ;;  %vm2021_vm13 = vmor %vm853_vm10, %vm854_vm11 }
 0x1c5   :  { %v1991_v22 = vadd.f32 1.0, %v1573_v15  ;;  %v850_v23 = vsub.f32 1.0, %v849_v17  ;;  %vm843_vm14 = vcmp.eq.f32.partialorder %v842_v11, 8.507059e+37 }
 0x1c6   :  { %1574 = vrcp.f32 %v1989_v19  ;;  %v836_v34 = vmul.f32 %v1967_v38, %v835_v21  ;;  %vm868_vm0 = vweird.f32 %v1989_v19  ;;  %v874_v15 = vand.u32 2147483648, %v1989_v19 }
 0x1c7   :  { %1576 = vrcp.f32 %v1991_v22  ;;  %v851_v37 = vmul.f32 %v1973_v1, %v850_v23  ;;  %vm883_vm2 = vweird.f32 %v1991_v22  ;;  %v889_v16 = vand.u32 2147483648, %v1991_v22 }
 0x1c8   :  { %1578 = vpow2.f32 %v1383_v32  ;;  %v837_v46 = vadd.f32 %v1967_v38, %v836_v34  ;;  %v2056_v18 = vpop.f32.mrf.mxu1  ;;  %v887_v21 = vand.u32 2147483647, %v1991_v22  ;;  %v875_v32 = vor.u32 1.1754944e-38, %v874_v15 }
 0x1c9   :  { %1580 = vpow2.f32 %v1384_v51  ;;  %v852_v48 = vadd.f32 %v1973_v1, %v851_v37 }
 0x1ca   :  { %v841_v7 = vsel %vm2014_vm12, %v1967_v38, %v837_v46  ;;  %vm888_vm7 = vcmp.eq.f32.partialorder %v887_v21, 8.507059e+37 }
 0x1cb   :  { %v856_v55 = vsel %vm2021_vm13, %v1973_v1, %v852_v48  ;;  %v846_v60 = vsel %vm843_vm14, %v845_v53, %v841_v7  ;;  %v1386_v1 = vmul.f32 -1.442695, %v1999_v33  ;;  %v1388_v48 = vmul.f32 -1.442695, %v2056_v18 }
 0x1cc   :  { %v2011_v45 = vpop.eup %1574  ;;  %v861_v61 = vsel %vm858_vm15, %v860_v54, %v856_v55  ;;  %v1045_v63 = vmul.f32 %v846_v60, %v1931_v25 }
 0x1cd   :  { %v2019_v49 = vpop.eup %1576  ;;  %v864_v56 = vmul.f32 %v2011_v45, %v1989_v19  ;;  %v1046_v0 = vmul.f32 %v861_v61, %v1937_v30  ;;  %vm869_vm1 = vweird.f32 %v2011_v45  ;;  %v872_v30 = vand.u32 2147483647, %v1989_v19 }
 0x1ce   :  { %v1579_v52 = vpop.eup %1578  ;;  %v879_v57 = vmul.f32 %v2019_v49, %v1991_v22  ;;  %vm884_vm3 = vweird.f32 %v2019_v49  ;;  %vm2061_vm4 = vmor %vm868_vm0, %vm869_vm1 }
 0x1cf   :  { %v1581_v12 = vpop.eup %1580  ;;  %v2037_v3 = vadd.f32 1.0, %v1579_v52  ;;  %v865_v62 = vsub.f32 1.0, %v864_v56  ;;  %vm885_vm5 = vmor %vm883_vm2, %vm884_vm3  ;;  %vm873_vm6 = vcmp.eq.f32.partialorder %v872_v30, 8.507059e+37 }
 0x1d0   :  { %v2039_v36 = vadd.f32 1.0, %v1581_v12  ;;  %v880_v38 = vsub.f32 1.0, %v879_v57  ;;  %v2084_v46 = vpop.f32.mrf.mxu1 }
 0x1d1   :  { %v699_v13 = vpop.f32.mrf.mxu2  ;;  %1582 = vrcp.f32 %v2037_v3  ;;  %v866_v6 = vmul.f32 %v2011_v45, %v865_v62  ;;  %vm898_vm8 = vweird.f32 %v2037_v3  ;;  %v904_v12 = vand.u32 2147483648, %v2037_v3 }
 0x1d2   :  { %v1059_v39 = vmul.f32 %v1043_v24, %v699_v13  ;;  %1584 = vrcp.f32 %v2039_v36  ;;  %v881_v9 = vmul.f32 %v2019_v49, %v880_v38  ;;  %v890_v24 = vor.u32 1.1754944e-38, %v889_v16 }
 0x1d3   :  { %1586 = vpow2.f32 %v1385_v28  ;;  %v867_v17 = vadd.f32 %v2011_v45, %v866_v6  ;;  %vm913_vm10 = vweird.f32 %v2039_v36  ;;  %v919_v7 = vand.u32 2147483648, %v2039_v36 }
 0x1d4   :  { %1588 = vpow2.f32 %v1386_v1  ;;  %v882_v8 = vadd.f32 %v2019_v49, %v881_v9  ;;  %v917_v60 = vand.u32 2147483647, %v2039_v36  ;;  %v905_v28 = vor.u32 1.1754944e-38, %v904_v12 }
 0x1d5   :  { %v871_v34 = vsel %vm2061_vm4, %v2011_v45, %v867_v17 }
 0x1d6   :  { %v886_v37 = vsel %vm885_vm5, %v2019_v49, %v882_v8  ;;  %vm918_vm15 = vcmp.eq.f32.partialorder %v917_v60, 8.507059e+37 }
 0x1d7   :  { %v2058_v31 = vpop.eup %1582 }
 0x1d8   :  { %v2067_v23 = vpop.eup %1584  ;;  %vm899_vm9 = vweird.f32 %v2058_v31 }
 0x1d9   :  { %v701_v35 = vpop.f32.mrf.mxu2  ;;  %v1587_v19 = vpop.eup %1586  ;;  %v909_v22 = vmul.f32 %v2067_v23, %v2039_v36  ;;  %vm914_vm11 = vweird.f32 %v2067_v23  ;;  %vm2103_vm12 = vmor %vm898_vm8, %vm899_vm9 }
 0x1da   :  { %v1060_v40 = vmul.f32 %v1044_v43, %v701_v35  ;;  %v894_v43 = vmul.f32 %v2058_v31, %v2037_v3  ;;  %v1589_v35 = vpop.eup %1588  ;;  %vm2111_vm13 = vmor %vm913_vm10, %vm914_vm11 }
 0x1db   :  { %v2081_v42 = vadd.f32 1.0, %v1589_v35  ;;  %v910_v44 = vsub.f32 1.0, %v909_v22 }
 0x1dc   :  { %v1075_v58 = vpack.c.bf16 %v1060_v40, %v1059_v39  ;;  %v2079_v39 = vadd.f32 1.0, %v1587_v19  ;;  %v876_v40 = vsel %vm873_vm6, %v875_v32, %v871_v34  ;;  %v895_v11 = vsub.f32 1.0, %v894_v43 }
 0x1dd   :  { %v1047_v45 = vmul.f32 %v876_v40, %v1941_v4  ;;  %v911_v52 = vmul.f32 %v2067_v23, %v910_v44  ;;  %vm943_vm2 = vweird.f32 %v2081_v42  ;;  %v947_v35 = vand.u32 2147483647, %v2081_v42 }
 0x1de   :  { %1155 = vmatmul.bf16.vlgmr.msra.gmra.mxu3 %v1075_v58  ;;  %v891_v58 = vsel %vm888_vm7, %v890_v24, %v886_v37  ;;  %1590 = vrcp.f32 %v2079_v39  ;;  %v896_v49 = vmul.f32 %v2058_v31, %v895_v11  ;;  %vm928_vm0 = vweird.f32 %v2079_v39 }
 0x1df   :  { %v1048_v26 = vmul.f32 %v891_v58, %v1947_v10  ;;  %1592 = vrcp.f32 %v2081_v42  ;;  %v912_v57 = vadd.f32 %v2067_v23, %v911_v52  ;;  %v932_v43 = vand.u32 2147483647, %v2079_v39 }
 0x1e0   :  { %1594 = vpow2.f32 %v1387_v27  ;;  %v897_v10 = vadd.f32 %v2058_v31, %v896_v49  ;;  %v949_v34 = vand.u32 2147483648, %v2081_v42  ;;  %vm948_vm7 = vcmp.eq.f32.partialorder %v947_v35, 8.507059e+37 }
 0x1e1   :  { %v704_v41 = vpop.f32.mrf.mxu2  ;;  %1596 = vpow2.f32 %v1388_v48  ;;  %v916_v36 = vsel %vm2111_vm13, %v2067_v23, %v912_v57  ;;  %vm933_vm6 = vcmp.eq.f32.partialorder %v932_v43, 8.507059e+37 }
 0x1e2   :  { %v1061_v29 = vmul.f32 %v1045_v63, %v704_v41  ;;  %v902_v41 = vand.u32 2147483647, %v2037_v3  ;;  %v901_v38 = vsel %vm2103_vm12, %v2058_v31, %v897_v10  ;;  %v920_v63 = vor.u32 1.1754944e-38, %v919_v7 }
 0x1e3   :  { %v1389_v31 = vmul.f32 -1.442695, %v2084_v46  ;;  %v950_v27 = vor.u32 1.1754944e-38, %v949_v34 }
 0x1e4   :  { %v2101_v55 = vpop.eup %1590  ;;  %vm903_vm14 = vcmp.eq.f32.partialorder %v902_v41, 8.507059e+37 }
 0x1e5   :  { %v2109_v61 = vpop.eup %1592  ;;  %v924_v6 = vmul.f32 %v2101_v55, %v2079_v39  ;;  %vm929_vm1 = vweird.f32 %v2101_v55 }
 0x1e6   :  { %v1595_v3 = vpop.eup %1594  ;;  %v939_v9 = vmul.f32 %v2109_v61, %v2081_v42  ;;  %vm944_vm3 = vweird.f32 %v2109_v61  ;;  %vm2152_vm4 = vmor %vm928_vm0, %vm929_vm1 }
 0x1e7   :  { %v925_v15 = vsub.f32 1.0, %v924_v6  ;;  %vm945_vm5 = vmor %vm943_vm2, %vm944_vm3 }
 0x1e8   :  { %v940_v16 = vsub.f32 1.0, %v939_v9 }
 0x1e9   :  { %v706_v2 = vpop.f32.mrf.mxu2  ;;  %v926_v23 = vmul.f32 %v2101_v55, %v925_v15 }
 0x1ea   :  { %v1062_v13 = vmul.f32 %v1046_v0, %v706_v2  ;;  %v2118_v0 = vpop.f32.mrf.mxu1  ;;  %v1597_v2 = vpop.eup %1596  ;;  %v941_v19 = vmul.f32 %v2109_v61, %v940_v16 }
 0x1eb   :  { %v2129_v30 = vadd.f32 1.0, %v1597_v2  ;;  %v1390_v8 = vmul.f32 -1.442695, %v2118_v0  ;;  %v927_v22 = vadd.f32 %v2101_v55, %v926_v23 }
 0x1ec   :  { %v1076_v25 = vpack.c.bf16 %v1062_v13, %v1061_v29  ;;  %v2127_v29 = vadd.f32 1.0, %v1595_v3  ;;  %v906_v13 = vsel %vm903_vm14, %v905_v28, %v901_v38  ;;  %v942_v58 = vadd.f32 %v2109_v61, %v941_v19 }
 0x1ed   :  { %v1049_v17 = vmul.f32 %v906_v13, %v1955_v47  ;;  %vm973_vm10 = vweird.f32 %v2129_v30 }
 0x1ee   :  { %1160 = vmatmul.bf16.gmra.mxu3 %v1076_v25  ;;  %v921_v25 = vsel %vm918_vm15, %v920_v63, %v916_v36  ;;  %1598 = vrcp.f32 %v2127_v29  ;;  %v946_v48 = vsel %vm945_vm5, %v2109_v61, %v942_v58  ;;  %vm958_vm8 = vweird.f32 %v2127_v29 }
 0x1ef   :  { %v1050_v20 = vmul.f32 %v921_v25, %v1961_v14  ;;  %1600 = vrcp.f32 %v2129_v30  ;;  %v964_v28 = vand.u32 2147483648, %v2127_v29  ;;  %v977_v63 = vand.u32 2147483647, %v2129_v30 }
 0x1f0   :  { %1602 = vpow2.f32 %v1389_v31 }
 0x1f1   :  { %v709_v51 = vpop.f32.mrf.mxu2  ;;  %1604 = vpow2.f32 %v1390_v8  ;;  %v965_v15 = vor.u32 1.1754944e-38, %v964_v28  ;;  %vm978_vm15 = vcmp.eq.f32.partialorder %v977_v63, 8.507059e+37 }
 0x1f2   :  { %v1063_v53 = vmul.f32 %v1047_v45, %v709_v51  ;;  %v2141_v47 = vpop.f32.mrf.mxu1  ;;  %v934_v51 = vand.u32 2147483648, %v2079_v39 }
 0x1f3   :  { %v1391_v7 = vmul.f32 -1.442695, %v2141_v47 }
 0x1f4   :  { %v2149_v37 = vpop.eup %1598  ;;  %v935_v39 = vor.u32 1.1754944e-38, %v934_v51 }
 0x1f5   :  { %v2157_v11 = vpop.eup %1600  ;;  %v954_v49 = vmul.f32 %v2149_v37, %v2127_v29  ;;  %vm959_vm9 = vweird.f32 %v2149_v37 }
 0x1f6   :  { %v1603_v44 = vpop.eup %1602  ;;  %vm974_vm11 = vweird.f32 %v2157_v11  ;;  %vm2190_vm12 = vmor %vm958_vm8, %vm959_vm9 }
 0x1f7   :  { %v1605_v45 = vpop.eup %1604  ;;  %v2167_v52 = vadd.f32 1.0, %v1603_v44  ;;  %v955_v41 = vsub.f32 1.0, %v954_v49  ;;  %vm975_vm13 = vmor %vm973_vm10, %vm974_vm11 }
 0x1f9   :  { %v711_v50 = vpop.f32.mrf.mxu2  ;;  %1606 = vrcp.f32 %v2167_v52  ;;  %v956_v61 = vmul.f32 %v2149_v37, %v955_v41  ;;  %vm988_vm0 = vweird.f32 %v2167_v52 }
 0x1fa   :  { %v1064_v54 = vmul.f32 %v1048_v26, %v711_v50  ;;  %v931_v26 = vsel %vm2152_vm4, %v2101_v55, %v927_v22  ;;  %v969_v50 = vmul.f32 %v2157_v11, %v2129_v30  ;;  %v2171_v10 = vpop.f32.mrf.mxu1 }
 0x1fb   :  { %v1392_v57 = vmul.f32 -1.442695, %v2171_v10  ;;  %v957_v36 = vadd.f32 %v2149_v37, %v956_v61 }
 0x1fc   :  { %v1077_v4 = vpack.c.bf16 %v1064_v54, %v1063_v53  ;;  %v936_v53 = vsel %vm933_vm6, %v935_v39, %v931_v26  ;;  %v951_v54 = vsel %vm948_vm7, %v950_v27, %v946_v48  ;;  %v970_v12 = vsub.f32 1.0, %v969_v50 }
 0x1fd   :  { %v1051_v55 = vmul.f32 %v936_v53, %v1979_v5  ;;  %v1052_v56 = vmul.f32 %v951_v54, %v1999_v33  ;;  %v962_v33 = vand.u32 2147483647, %v2127_v29 }
 0x1fe   :  { %1165 = vmatmul.bf16.gmra.mxu3 %v1077_v4  ;;  %v2169_v4 = vadd.f32 1.0, %v1605_v45  ;;  %v971_v62 = vmul.f32 %v2157_v11, %v970_v12 }
 0x1ff   :  { %v1607_v2 = vpop.eup %1606  ;;  %vm963_vm14 = vcmp.eq.f32.partialorder %v962_v33, 8.507059e+37 }
 0x200   :  { %1608 = vrcp.f32 %v2169_v4  ;;  %v972_v9 = vadd.f32 %v2157_v11, %v971_v62  ;;  %vm989_vm1 = vweird.f32 %v1607_v2  ;;  %vm1003_vm2 = vweird.f32 %v2169_v4 }
 0x201   :  { %v714_v1 = vpop.f32.mrf.mxu2  ;;  %1610 = vpow2.f32 %v1391_v7  ;;  %v1009_v44 = vand.u32 2147483648, %v2169_v4  ;;  %vm990_vm4 = vmor %vm988_vm0, %vm989_vm1 }
 0x202   :  { %v1065_v32 = vmul.f32 %v1049_v17, %v714_v1  ;;  %1612 = vpow2.f32 %v1392_v57  ;;  %v979_v1 = vand.u32 2147483648, %v2129_v30  ;;  %v961_v30 = vsel %vm2190_vm12, %v2149_v37, %v957_v36 }
 0x203   :  { %v976_v17 = vsel %vm975_vm13, %v2157_v11, %v972_v9  ;;  %v966_v23 = vsel %vm963_vm14, %v965_v15, %v961_v30  ;;  %v1007_v11 = vand.u32 2147483647, %v2169_v4  ;;  %v1010_v48 = vor.u32 1.1754944e-38, %v1009_v44 }
 0x204   :  { %v980_v29 = vor.u32 1.1754944e-38, %v979_v1  ;;  %v1053_v43 = vmul.f32 %v966_v23, %v2035_v59  ;;  %v992_v59 = vand.u32 2147483647, %v2167_v52 }
 0x205   :  { %vm1008_vm7 = vcmp.eq.f32.partialorder %v1007_v11, 8.507059e+37 }
 0x206   :  { %v1609_v13 = vpop.eup %1608  ;;  %v981_v19 = vsel %vm978_vm15, %v980_v29, %v976_v17  ;;  %vm993_vm6 = vcmp.eq.f32.partialorder %v992_v59, 8.507059e+37 }
 0x207   :  { %v1611_v25 = vpop.eup %1610  ;;  %v999_v8 = vmul.f32 %v1609_v13, %v2169_v4  ;;  %v1054_v51 = vmul.f32 %v981_v19, %v2056_v18  ;;  %vm1004_vm3 = vweird.f32 %v1609_v13  ;;  %v994_v18 = vand.u32 2147483648, %v2167_v52 }
 0x208   :  { %v1613_v31 = vpop.eup %1612  ;;  %vm1005_vm5 = vmor %vm1003_vm2, %vm1004_vm3 }
 0x209   :  { %v716_v21 = vpop.f32.mrf.mxu2  ;;  %v995_v26 = vor.u32 1.1754944e-38, %v994_v18 }
 0x20a   :  { %v1066_v24 = vmul.f32 %v1050_v20, %v716_v21  ;;  %v984_v20 = vmul.f32 %v1607_v2, %v2167_v52  ;;  %v2201_v21 = vadd.f32 1.0, %v1611_v25 }
 0x20c   :  { %v1078_v14 = vpack.c.bf16 %v1066_v24, %v1065_v32  ;;  %v2203_v32 = vadd.f32 1.0, %v1613_v31  ;;  %v985_v24 = vsub.f32 1.0, %v984_v20  ;;  %1614 = vrcp.f32 %v2201_v21 }
 0x20d   :  { %vm1018_vm8 = vweird.f32 %v2201_v21 }
 0x20e   :  { %1170 = vmatmul.bf16.gmra.mxu3 %v1078_v14  ;;  %v1000_v14 = vsub.f32 1.0, %v999_v8  ;;  %1616 = vrcp.f32 %v2203_v32  ;;  %v986_v34 = vmul.f32 %v1607_v2, %v985_v24  ;;  %vm1033_vm10 = vweird.f32 %v2203_v32 }
 0x20f   :  { %v1039_v33 = vand.u32 2147483648, %v2203_v32  ;;  %v1037_v63 = vand.u32 2147483647, %v2203_v32 }
 0x210   :  { %v1001_v37 = vmul.f32 %v1609_v13, %v1000_v14  ;;  %v987_v27 = vadd.f32 %v1607_v2, %v986_v34 }
 0x211   :  { %v719_v42 = vpop.f32.mrf.mxu2  ;;  %vm1038_vm15 = vcmp.eq.f32.partialorder %v1037_v63, 8.507059e+37 }
 0x212   :  { %v1067_v3 = vmul.f32 %v1051_v55, %v719_v42  ;;  %v1615_v39 = vpop.eup %1614  ;;  %v1002_v42 = vadd.f32 %v1609_v13, %v1001_v37  ;;  %v991_v50 = vsel %vm990_vm4, %v1607_v2, %v987_v27  ;;  %v1040_v2 = vor.u32 1.1754944e-38, %v1039_v33 }
 0x213   :  { %v1014_v52 = vmul.f32 %v1615_v39, %v2201_v21  ;;  %v996_v41 = vsel %vm993_vm6, %v995_v26, %v991_v50  ;;  %vm1019_vm9 = vweird.f32 %v1615_v39 }
 0x214   :  { %v1617_v45 = vpop.eup %1616  ;;  %v1006_v53 = vsel %vm1005_vm5, %v1609_v13, %v1002_v42  ;;  %v1055_v55 = vmul.f32 %v996_v41, %v2084_v46  ;;  %vm1020_vm12 = vmor %vm1018_vm8, %vm1019_vm9  ;;  %v1022_v46 = vand.u32 2147483647, %v2201_v21 }
 0x215   :  { %v1029_v54 = vmul.f32 %v1617_v45, %v2203_v32  ;;  %v1011_v4 = vsel %vm1008_vm7, %v1010_v48, %v1006_v53  ;;  %v1015_v12 = vsub.f32 1.0, %v1014_v52  ;;  %vm1034_vm11 = vweird.f32 %v1617_v45 }
 0x216   :  { %vm1035_vm13 = vmor %vm1033_vm10, %vm1034_vm11  ;;  %vm1023_vm14 = vcmp.eq.f32.partialorder %v1022_v46, 8.507059e+37 }
 0x217   :  { %v1030_v7 = vsub.f32 1.0, %v1029_v54 }
 0x219   :  { %v721_v60 = vpop.f32.mrf.mxu2  ;;  %v1031_v61 = vmul.f32 %v1617_v45, %v1030_v7 }
 0x21a   :  { %v1068_v38 = vmul.f32 %v1052_v56, %v721_v60  ;;  %v1056_v56 = vmul.f32 %v1011_v4, %v2118_v0  ;;  %v1016_v60 = vmul.f32 %v1615_v39, %v1015_v12 }
 0x21b   :  { %v1032_v0 = vadd.f32 %v1617_v45, %v1031_v61 }
 0x21c   :  { %v1079_v5 = vpack.c.bf16 %v1068_v38, %v1067_v3  ;;  %v1017_v28 = vadd.f32 %v1615_v39, %v1016_v60 }
 0x21d   :  { %v1036_v9 = vsel %vm1035_vm13, %v1617_v45, %v1032_v0 }
 0x21e   :  { %1175 = vmatmul.bf16.gmra.mxu3 %v1079_v5  ;;  %v1024_v5 = vand.u32 2147483648, %v2201_v21  ;;  %v1021_v6 = vsel %vm1020_vm12, %v1615_v39, %v1017_v28  ;;  %v1041_v25 = vsel %vm1038_vm15, %v1040_v2, %v1036_v9 }
 0x21f   :  { %v1058_v29 = vmul.f32 %v1041_v25, %v2171_v10 }
 0x220   :  { %v1025_v1 = vor.u32 1.1754944e-38, %v1024_v5 }
 0x221   :  { %v724_v16 = vpop.f32.mrf.mxu2 }
 0x222   :  { %v1069_v22 = vmul.f32 %v1053_v43, %v724_v16  ;;  %v1026_v13 = vsel %vm1023_vm14, %v1025_v1, %v1021_v6 }
 0x223   :  { %v1057_v15 = vmul.f32 %v1026_v13, %v2141_v47 }
 0x229   :  { %v726_v35 = vpop.f32.mrf.mxu2 }
 0x22a   :  { %v1070_v40 = vmul.f32 %v1054_v51, %v726_v35 }
 0x22c   :  { %v1080_v58 = vpack.c.bf16 %v1070_v40, %v1069_v22 }
 0x22e   :  { %1180 = vmatmul.bf16.gmra.mxu3 %v1080_v58 }
 0x231   :  { %v729_v49 = vpop.f32.mrf.mxu2 }
 0x232   :  { %v1071_v62 = vmul.f32 %v1055_v55, %v729_v49 }
 0x239   :  { %v731_v57 = vpop.f32.mrf.mxu2 }
 0x23a   :  { %v1072_v3 = vmul.f32 %v1056_v56, %v731_v57 }
 0x23c   :  { %v1081_v38 = vpack.c.bf16 %v1072_v3, %v1071_v62 }
 0x23e   :  { %1185 = vmatmul.bf16.gmra.mxu3 %v1081_v38 }
 0x241   :  { %v734_v36 = vpop.f32.mrf.mxu2 }
 0x242   :  { %v1073_v31 = vmul.f32 %v1057_v15, %v734_v36 }
 0x249   :  { %v736_v16 = vpop.f32.mrf.mxu2 }
 0x24a   :  { %v1074_v30 = vmul.f32 %v1058_v29, %v736_v16 }
 0x24c   :  { %v1082_v17 = vpack.c.bf16 %v1074_v30, %v1073_v31 }
 0x24e   :  { %1190 = vmatmul.bf16.gmra.mxu3 %v1082_v17 }
 0x261   :  { %v1156_v20 = vpop.f32.mrf.mxu3 }
 0x269   :  { %v1158_v8 = vpop.f32.mrf.mxu3 }
 0x26a   :  { %v1468_v21 = vpack.c.bf16 %v1158_v8, %v1156_v20 }
 0x26c   :  { %1469 = vst [vmem:[#allocation10] sm:$0xff] %v1468_v21  }
 0x271   :  { %v1161_v23 = vpop.f32.mrf.mxu3 }
 0x279   :  { %v1163_v19 = vpop.f32.mrf.mxu3 }
 0x27a   :  { %v1473_v32 = vpack.c.bf16 %v1163_v19, %v1161_v23 }
 0x27c   :  { %1505 = vst [vmem:[#allocation10 + $0x8] sm:$0xff] %v1473_v32  }
 0x281   :  { %v1166_v24 = vpop.f32.mrf.mxu3 }
 0x289   :  { %v1168_v14 = vpop.f32.mrf.mxu3 }
 0x28a   :  { %v1478_v43 = vpack.c.bf16 %v1168_v14, %v1166_v24 }
 0x28c   :  { %1506 = vst [vmem:[#allocation10 + $0x10] sm:$0xff] %v1478_v43  }
 0x291   :  { %v1171_v47 = vpop.f32.mrf.mxu3 }
 0x299   :  { %v1173_v51 = vpop.f32.mrf.mxu3 }
 0x29a   :  { %v1483_v10 = vpack.c.bf16 %v1173_v51, %v1171_v47 }
 0x29c   :  { %1507 = vst [vmem:[#allocation10 + $0x18] sm:$0xff] %v1483_v10  }
 0x2a1   :  { %v1176_v35 = vpop.f32.mrf.mxu3 }
 0x2a9   :  { %v1178_v34 = vpop.f32.mrf.mxu3 }
 0x2aa   :  { %v1488_v37 = vpack.c.bf16 %v1178_v34, %v1176_v35 }
 0x2ac   :  { %1508 = vst [vmem:[#allocation10 + $0x20] sm:$0xff] %v1488_v37  }
 0x2b1   :  { %v1181_v22 = vpop.f32.mrf.mxu3 }
 0x2b9   :  { %v1183_v40 = vpop.f32.mrf.mxu3 }
 0x2ba   :  { %v1493_v58 = vpack.c.bf16 %v1183_v40, %v1181_v22 }
 0x2bc   :  { %1509 = vst [vmem:[#allocation10 + $0x28] sm:$0xff] %v1493_v58  }
 0x2c1   :  { %v1186_v59 = vpop.f32.mrf.mxu3 }
 0x2c9   :  { %v1188_v18 = vpop.f32.mrf.mxu3 }
 0x2ca   :  { %v1498_v11 = vpack.c.bf16 %v1188_v18, %v1186_v59 }
 0x2cc   :  { %1510 = vst [vmem:[#allocation10 + $0x30] sm:$0xff] %v1498_v11  }
 0x2d1   :  { %v1191_v44 = vpop.f32.mrf.mxu3 }
 0x2d9   :  { %v1193_v39 = vpop.f32.mrf.mxu3 }
 0x2da   :  { %v1503_v27 = vpack.c.bf16 %v1193_v39, %v1191_v44 }
 0x2dc   :  { %1511 = vst [vmem:[#allocation10 + $0x38] sm:$0xff] %v1503_v27  }
 0x2dd   :  { %1240 = dma.vmem_to_hbm [thread:$0]  %s1233_s15, 1024, %s1235_s18, [#allocation4], %s1750_s30, %s1750_s30, %s1751_s6  }
 0x2de   :  { %1744 = dma.done.wait [#allocation4], 1024  }
 0x2df   :  { %1745 = vsyncadd [#allocation4], 4294966272 }
 0x2e0   :  { %1245 = vsyncpa [#allocation3], 1 }
 0x2e1   :  { %1246 = vsyncpa [#allocation6], 1 }
 0x2e2   :  { %1247 = vsyncpa [#allocation9], 1 }
 0x2e3   :  { %1248 = vsyncpa [#allocation4], 1 }

// kernel: tpu_custom_call.1
= control target key start
LH: loop header
LB: loop body
LE: loop exit
PB: predicated region body
PF: predicated region fallthrough
CT: control target
= control target key end

     0   :  { %10 = vsyncpa [#allocation3], 0  ;;  %s2233_s0 = inlined_call_operand.hbm [shape: bf16[128,128], index: 0, kind: input, shape index: {}]   ;;  %s2234_s1 = inlined_call_operand.hbm [shape: bf16[128,256], index: 1, kind: input, shape index: {}]   ;;  %s2235_s2 = inlined_call_operand.vmem [shape: f32[1,128], index: 2, kind: input, shape index: {}]   ;;  %s2236_s3 = inlined_call_operand.hbm [shape: bf16[128,128], index: 3, kind: input, shape index: {}]   ;;  %s2237_s4 = inlined_call_operand.hbm [shape: bf16[128,128], index: 4, kind: input, shape index: {}]   ;;  %s2238_s5 = inlined_call_operand.hbm [shape: bf16[128,128], index: 5, kind: output, shape index: {}]  }
   0x1   :  { %11 = vsyncpa [#allocation6], 0 }
   0x2   :  { %12 = vsyncpa [#allocation9], 0  ;;  %s31_s20 = sshll.u32 %s2234_s1, 4  ;;  %s32_s20 = int_to_ptr.hbm [resolvable:$true] %s31_s20 }
   0x3   :  { %13 = vsyncpa [#allocation4], 0  ;;  %s1746_s21 = smov [#allocation5]   ;;  %s18_s25 = sshll.u32 %s2233_s0, 4  ;;  %s19_s25 = int_to_ptr.hbm [resolvable:$true] %s18_s25 }
   0x4   :  { %s33_s22 = sshll.u32 %s1746_s21, 4  ;;  %s1747_s26 = smov 128   ;;  %s34_s22 = int_to_ptr.vmem [resolvable:$true] %s33_s22 }
   0x5   :  { %s1748_s27 = smov 8   ;;  %s1749_s28 = smov [#allocation2]  }
   0x6   :  { %39 = dma.hbm_to_vmem [thread:$0]  %s32_s20, 2048, %s34_s22, [#allocation6], %s1747_s26, %s1747_s26, %s1748_s27  }
   0x7   :  { %s20_s29 = sshll.u32 %s1749_s28, 4  ;;  %s1750_s30 = smov 64   ;;  %s21_s29 = int_to_ptr.vmem [resolvable:$true] %s20_s29 }
   0x8   :  { %s1751_s6 = smov 4   ;;  %s46_s8 = sshll.u32 %s2236_s3, 4  ;;  %s47_s8 = int_to_ptr.hbm [resolvable:$true] %s46_s8 }
   0x9   :  { %26 = dma.hbm_to_vmem [thread:$0]  %s19_s25, 1024, %s21_s29, [#allocation3], %s1750_s30, %s1750_s30, %s1751_s6  }
   0xa   :  { %s1752_s9 = smov [#allocation7]   ;;  %s59_s12 = sshll.u32 %s2237_s4, 4  ;;  %s60_s12 = int_to_ptr.hbm [resolvable:$true] %s59_s12 }
   0xb   :  { %s48_s0 = sshll.u32 %s1752_s9, 4  ;;  %s1753_s13 = smov [#allocation8]   ;;  %s49_s0 = int_to_ptr.vmem [resolvable:$true] %s48_s0 }
   0xc   :  { %54 = dma.hbm_to_vmem [thread:$0]  %s47_s8, 1024, %s49_s0, [#allocation6], %s1750_s30, %s1750_s30, %s1751_s6  }
   0xd   :  { %s61_s14 = sshll.u32 %s1753_s13, 4  ;;  %s62_s14 = int_to_ptr.vmem [resolvable:$true] %s61_s14 }
   0xe   :  { %67 = dma.hbm_to_vmem [thread:$0]  %s60_s12, 1024, %s62_s14, [#allocation9], %s1750_s30, %s1750_s30, %s1751_s6  }
   0xf   :  { %1738 = dma.done.wait [#allocation3], 1024  }
  0x10   :  { %1739 = vsyncadd [#allocation3], 4294966272 }
  0x11   :  { %1740 = dma.done.wait [#allocation6], 3072  }
  0x12   :  { %1741 = vsyncadd [#allocation6], 4294964224 }
  0x13   :  { %1742 = dma.done.wait [#allocation9], 1024  }
  0x14   :  { %1743 = vsyncadd [#allocation9], 4294966272  ;;  %v1339_v0 = vld [vmem:[#allocation5 + $0x70] sm:$0xf]  ;;  %v1448_v1 = vld [vmem:[#allocation5 + $0x74] sm:$0xf0] }
  0x15   :  { %v1331_v2 = vld [vmem:[#allocation5 + $0x60] sm:$0xf]  ;;  %v1340_v3 = vor.u32 %v1448_v1, %v1339_v0  ;;  %v1446_v4 = vld [vmem:[#allocation5 + $0x64] sm:$0xf0]  ;;  %v1323_v6 = vld [vmem:[#allocation5 + $0x50] sm:$0xf] }
  0x16   :  { %v1332_v5 = vor.u32 %v1446_v4, %v1331_v2  ;;  %v1444_v7 = vld [vmem:[#allocation5 + $0x54] sm:$0xf0]  ;;  %v1315_v9 = vld [vmem:[#allocation5 + $0x40] sm:$0xf]  ;;  %v1442_v10 = vld [vmem:[#allocation5 + $0x44] sm:$0xf0] }
  0x17   :  { %244 = vmatpush.bf16.msra.mxu0 %v1340_v3  ;;  %v1324_v8 = vor.u32 %v1444_v7, %v1323_v6  ;;  %v1316_v11 = vor.u32 %v1442_v10, %v1315_v9  ;;  %v1307_v12 = vld [vmem:[#allocation5 + $0x30] sm:$0xf]  ;;  %v1440_v13 = vld [vmem:[#allocation5 + $0x34] sm:$0xf0]  ;;  %v1299_v15 = vld [vmem:[#allocation5 + $0x20] sm:$0xf] }
  0x18   :  { %v1308_v14 = vor.u32 %v1440_v13, %v1307_v12  ;;  %v1438_v16 = vld [vmem:[#allocation5 + $0x24] sm:$0xf0]  ;;  %v1291_v18 = vld [vmem:[#allocation5 + $0x10] sm:$0xf]  ;;  %v1436_v19 = vld [vmem:[#allocation5 + $0x14] sm:$0xf0] }
  0x19   :  { %v1300_v17 = vor.u32 %v1438_v16, %v1299_v15  ;;  %v1292_v20 = vor.u32 %v1436_v19, %v1291_v18  ;;  %v1283_v21 = vld [vmem:[#allocation5] sm:$0xf]  ;;  %v1434_v22 = vld [vmem:[#allocation5 + $0x4] sm:$0xf0]  ;;  %v1812_v26 = vld [vmem:[#allocation2 + $0x10] sm:$0xff]  ;;  %s1234_s18 = sshll.u32 %s2238_s5, 4  ;;  %s1235_s18 = int_to_ptr.hbm [resolvable:$true] %s1234_s18 }
  0x1a   :  { %v1284_v23 = vor.u32 %v1434_v22, %v1283_v21  ;;  %v1806_v24 = vld [vmem:[#allocation2] sm:$0xff]  ;;  %v1809_v25 = vld [vmem:[#allocation2 + $0x8] sm:$0xff]  ;;  %v1815_v27 = vld [vmem:[#allocation2 + $0x18] sm:$0xff] }
  0x1b   :  { %245 = vmatpush.bf16.msra.mxu0 %v1332_v5  ;;  %v1818_v28 = vld [vmem:[#allocation2 + $0x20] sm:$0xff]  ;;  %v1821_v29 = vld [vmem:[#allocation2 + $0x28] sm:$0xff]  ;;  %v1824_v30 = vld [vmem:[#allocation2 + $0x30] sm:$0xff] }
  0x1c   :  { %v1827_v31 = vld [vmem:[#allocation2 + $0x38] sm:$0xff]  ;;  %v1447_v40 = vld [vmem:[#allocation5 + $0x74] sm:$0xf]  ;;  %v1445_v45 = vld [vmem:[#allocation5 + $0x64] sm:$0xf] }
  0x1d   :  { %v1341_v41 = vld [vmem:[#allocation5 + $0x78] sm:$0xf0]  ;;  %v1333_v46 = vld [vmem:[#allocation5 + $0x68] sm:$0xf0]  ;;  %v1443_v48 = vld [vmem:[#allocation5 + $0x54] sm:$0xf] }
  0x1e   :  { %v1344_v42 = vor.u32 %v1447_v40, %v1341_v41  ;;  %v1336_v47 = vor.u32 %v1445_v45, %v1333_v46  ;;  %v1325_v49 = vld [vmem:[#allocation5 + $0x58] sm:$0xf0]  ;;  %v1441_v53 = vld [vmem:[#allocation5 + $0x44] sm:$0xf]  ;;  %v1317_v54 = vld [vmem:[#allocation5 + $0x48] sm:$0xf0] }
  0x1f   :  { %246 = vmatpush.bf16.msra.mxu0 %v1324_v8  ;;  %v1328_v50 = vor.u32 %v1443_v48, %v1325_v49  ;;  %v1320_v55 = vor.u32 %v1441_v53, %v1317_v54  ;;  %v1439_v56 = vld [vmem:[#allocation5 + $0x34] sm:$0xf]  ;;  %v1309_v57 = vld [vmem:[#allocation5 + $0x38] sm:$0xf0]  ;;  %v1437_v61 = vld [vmem:[#allocation5 + $0x24] sm:$0xf] }
  0x20   :  { %293 = vmatpush.bf16.msra.mxu1 %v1344_v42  ;;  %v1312_v58 = vor.u32 %v1439_v56, %v1309_v57  ;;  %v1301_v62 = vld [vmem:[#allocation5 + $0x28] sm:$0xf0]  ;;  %v1435_v0 = vld [vmem:[#allocation5 + $0x14] sm:$0xf]  ;;  %v1293_v1 = vld [vmem:[#allocation5 + $0x18] sm:$0xf0] }
  0x21   :  { %v1304_v63 = vor.u32 %v1437_v61, %v1301_v62  ;;  %v1296_v2 = vor.u32 %v1435_v0, %v1293_v1  ;;  %v1433_v5 = vld [vmem:[#allocation5 + $0x4] sm:$0xf]  ;;  %v1285_v6 = vld [vmem:[#allocation5 + $0x8] sm:$0xf0]  ;;  %v1456_v16 = vld [vmem:[#allocation7 + $0x38] sm:$0xff] }
  0x22   :  { %v1288_v7 = vor.u32 %v1433_v5, %v1285_v6  ;;  %690 = vmatpush.bf16.msra.mxu2 %v1456_v16  ;;  %v1453_v21 = vld [vmem:[#allocation7 + $0x20] sm:$0xff] }
  0x23   :  { %247 = vmatpush.bf16.msra.mxu0 %v1316_v11 }
  0x24   :  { %294 = vmatpush.bf16.msra.mxu1 %v1336_v47 }
  0x27   :  { %248 = vmatpush.bf16.msra.mxu0 %v1308_v14 }
  0x28   :  { %295 = vmatpush.bf16.msra.mxu1 %v1328_v50 }
  0x2b   :  { %249 = vmatpush.bf16.msra.mxu0 %v1300_v17  ;;  %v1455_v17 = vld [vmem:[#allocation7 + $0x30] sm:$0xff] }
  0x2c   :  { %296 = vmatpush.bf16.msra.mxu1 %v1320_v55  ;;  %691 = vmatpush.bf16.msra.mxu2 %v1455_v17 }
  0x2f   :  { %250 = vmatpush.bf16.msra.mxu0 %v1292_v20  ;;  %v1454_v20 = vld [vmem:[#allocation7 + $0x28] sm:$0xff] }
  0x30   :  { %297 = vmatpush.bf16.msra.mxu1 %v1312_v58  ;;  %692 = vmatpush.bf16.msra.mxu2 %v1454_v20 }
  0x33   :  { %251 = vmatpush.bf16.msra.mxu0 %v1284_v23 }
  0x34   :  { %298 = vmatpush.bf16.msra.mxu1 %v1304_v63  ;;  %693 = vmatpush.bf16.msra.mxu2 %v1453_v21 }
  0x36   :  { %252 = vmatmul.bf16.vlgmr.msra.gmra.mxu0 %v1806_v24 }
  0x38   :  { %299 = vmatpush.bf16.msra.mxu1 %v1296_v2 }
  0x3c   :  { %300 = vmatpush.bf16.msra.mxu1 %v1288_v7  ;;  %v1904_v7 = vld [vmem:[%s2235_s2] ss:$0 sm:$0xff]  ;;  %s1754_s2 = smov [#allocation10]  }
  0x3d   :  { %s1232_s15 = sshll.u32 %s1754_s2, 4  ;;  %s1233_s15 = int_to_ptr.vmem [resolvable:$true] %s1232_s15 }
  0x3f   :  { %301 = vmatmul.bf16.vlgmr.msra.gmra.mxu1 %v1806_v24  ;;  %v1452_v24 = vld [vmem:[#allocation7 + $0x18] sm:$0xff] }
  0x40   :  { %694 = vmatpush.bf16.msra.mxu2 %v1452_v24 }
  0x46   :  { %257 = vmatmul.bf16.gmra.mxu0 %v1809_v25 }
  0x4f   :  { %306 = vmatmul.bf16.gmra.mxu1 %v1809_v25  ;;  %v1451_v25 = vld [vmem:[#allocation7 + $0x10] sm:$0xff] }
  0x50   :  { %695 = vmatpush.bf16.msra.mxu2 %v1451_v25 }
  0x56   :  { %262 = vmatmul.bf16.gmra.mxu0 %v1812_v26 }
  0x5f   :  { %311 = vmatmul.bf16.gmra.mxu1 %v1812_v26 }
  0x66   :  { %267 = vmatmul.bf16.gmra.mxu0 %v1815_v27 }
  0x6f   :  { %316 = vmatmul.bf16.gmra.mxu1 %v1815_v27 }
  0x76   :  { %272 = vmatmul.bf16.gmra.mxu0 %v1818_v28 }
  0x7f   :  { %321 = vmatmul.bf16.gmra.mxu1 %v1818_v28 }
  0x86   :  { %277 = vmatmul.bf16.gmra.mxu0 %v1821_v29 }
  0x8f   :  { %326 = vmatmul.bf16.gmra.mxu1 %v1821_v29 }
  0x96   :  { %282 = vmatmul.bf16.gmra.mxu0 %v1824_v30 }
  0x9f   :  { %331 = vmatmul.bf16.gmra.mxu1 %v1824_v30 }
  0xa6   :  { %287 = vmatmul.bf16.gmra.mxu0 %v1827_v31 }
  0xaf   :  { %336 = vmatmul.bf16.gmra.mxu1 %v1827_v31 }
  0xb3   :  { %v1830_v32 = vpop.f32.mrf.mxu0 }
  0xb4   :  { %v342_v33 = vmul.f32 %v1830_v32, %v1830_v32 }
  0xb6   :  { %358 = vadd.xlane.f32.xlu0 %v342_v33 }
  0xbb   :  { %v1834_v34 = vpop.f32.mrf.mxu0 }
  0xbc   :  { %v343_v35 = vmul.f32 %v1834_v34, %v1834_v34 }
  0xbe   :  { %360 = vadd.xlane.f32.xlu0 %v343_v35  ;;  %v1450_v35 = vld [vmem:[#allocation7 + $0x8] sm:$0xff] }
  0xbf   :  { %696 = vmatpush.bf16.msra.mxu2 %v1450_v35 }
  0xc3   :  { %v1838_v36 = vpop.f32.mrf.mxu0 }
  0xc4   :  { %v344_v37 = vmul.f32 %v1838_v36, %v1838_v36 }
  0xc6   :  { %362 = vadd.xlane.f32.xlu1 %v344_v37 }
  0xcb   :  { %v1842_v38 = vpop.f32.mrf.mxu0 }
  0xcc   :  { %v345_v39 = vmul.f32 %v1842_v38, %v1842_v38 }
  0xce   :  { %364 = vadd.xlane.f32.xlu1 %v345_v39  ;;  %v1449_v39 = vld [vmem:[#allocation7] sm:$0xff] }
  0xcf   :  { %697 = vmatpush.bf16.msra.mxu2 %v1449_v39 }
  0xd3   :  { %v1846_v43 = vpop.f32.mrf.mxu0 }
  0xd4   :  { %v346_v44 = vmul.f32 %v1846_v43, %v1846_v43 }
  0xd6   :  { %366 = vadd.xlane.f32.xlu2 %v346_v44 }
  0xdb   :  { %v1850_v51 = vpop.f32.mrf.mxu0 }
  0xdc   :  { %v347_v52 = vmul.f32 %v1850_v51, %v1850_v51 }
  0xde   :  { %368 = vadd.xlane.f32.xlu2 %v347_v52 }
  0xe3   :  { %v1854_v59 = vpop.f32.mrf.mxu0 }
  0xe4   :  { %v348_v60 = vmul.f32 %v1854_v59, %v1854_v59 }
  0xe6   :  { %370 = vadd.xlane.f32.xlu0 %v348_v60 }
  0xeb   :  { %v1858_v3 = vpop.f32.mrf.mxu0 }
  0xec   :  { %v349_v4 = vmul.f32 %v1858_v3, %v1858_v3 }
  0xee   :  { %372 = vadd.xlane.f32.xlu1 %v349_v4 }
  0xf3   :  { %v1863_v8 = vpop.f32.mrf.mxu0 }
  0xf4   :  { %v350_v9 = vmul.f32 %v1863_v8, %v1863_v8 }
  0xf6   :  { %374 = vadd.xlane.f32.xlu2 %v350_v9 }
  0xfb   :  { %v1867_v10 = vpop.f32.mrf.mxu0 }
  0xfc   :  { %v351_v11 = vmul.f32 %v1867_v10, %v1867_v10 }
  0xfe   :  { %376 = vadd.xlane.f32.xlu0 %v351_v11 }
 0x103   :  { %v1872_v12 = vpop.f32.mrf.mxu0 }
 0x104   :  { %v352_v13 = vmul.f32 %v1872_v12, %v1872_v12 }
 0x106   :  { %378 = vadd.xlane.f32.xlu1 %v352_v13 }
 0x10b   :  { %v1876_v14 = vpop.f32.mrf.mxu0 }
 0x10c   :  { %v353_v15 = vmul.f32 %v1876_v14, %v1876_v14 }
 0x10e   :  { %380 = vadd.xlane.f32.xlu2 %v353_v15 }
 0x113   :  { %v1881_v18 = vpop.f32.mrf.mxu0 }
 0x114   :  { %v354_v19 = vmul.f32 %v1881_v18, %v1881_v18 }
 0x116   :  { %382 = vadd.xlane.f32.xlu0 %v354_v19 }
 0x11b   :  { %v1885_v22 = vpop.f32.mrf.mxu0 }
 0x11c   :  { %v355_v23 = vmul.f32 %v1885_v22, %v1885_v22 }
 0x11e   :  { %384 = vadd.xlane.f32.xlu1 %v355_v23 }
 0x123   :  { %v1890_v26 = vpop.f32.mrf.mxu0 }
 0x124   :  { %v356_v33 = vmul.f32 %v1890_v26, %v1890_v26 }
 0x126   :  { %386 = vadd.xlane.f32.xlu2 %v356_v33 }
 0x129   :  { %v359_v37 = vpop.xlane.xlu0 %358 }
 0x12a   :  { %v390_v40 = vmul.f32 0.0078125, %v359_v37 }
 0x12b   :  { %v1894_v41 = vpop.f32.mrf.mxu0 }
 0x12c   :  { %v406_v42 = vadd.f32 1e-06, %v390_v40  ;;  %v357_v44 = vmul.f32 %v1894_v41, %v1894_v41 }
 0x12e   :  { %1522 = vrsqrt.f32 %v406_v42  ;;  %388 = vadd.xlane.f32.xlu0 %v357_v44  ;;  %vm428_vm1 = vweird.f32 %v406_v42 }
 0x131   :  { %v361_v27 = vpop.xlane.xlu0 %360 }
 0x132   :  { %v391_v45 = vmul.f32 0.0078125, %v361_v27 }
 0x134   :  { %v1523_v46 = vpop.eup %1522  ;;  %v407_v47 = vadd.f32 1e-06, %v391_v45 }
 0x135   :  { %v423_v48 = vmul.f32 %v1523_v46, %v406_v42  ;;  %vm429_vm0 = vweird.f32 %v1523_v46 }
 0x136   :  { %1524 = vrsqrt.f32 %v407_v47  ;;  %vm430_vm2 = vmor %vm428_vm1, %vm429_vm0  ;;  %vm438_vm4 = vweird.f32 %v407_v47 }
 0x137   :  { %v424_v49 = vmul.f32 %v1523_v46, %v423_v48 }
 0x139   :  { %v425_v50 = vmul.f32 0.5, %v424_v49  ;;  %v363_v52 = vpop.xlane.xlu1 %362 }
 0x13a   :  { %v392_v53 = vmul.f32 0.0078125, %v363_v52 }
 0x13b   :  { %v426_v54 = vsub.f32 1.5, %v425_v50 }
 0x13c   :  { %v1525_v55 = vpop.eup %1524  ;;  %v408_v56 = vadd.f32 1e-06, %v392_v53 }
 0x13d   :  { %v433_v57 = vmul.f32 %v1525_v55, %v407_v47  ;;  %v427_v58 = vmul.f32 %v1523_v46, %v426_v54  ;;  %vm439_vm3 = vweird.f32 %v1525_v55 }
 0x13e   :  { %1526 = vrsqrt.f32 %v408_v56  ;;  %vm440_vm5 = vmor %vm438_vm4, %vm439_vm3  ;;  %vm448_vm7 = vweird.f32 %v408_v56 }
 0x13f   :  { %v434_v60 = vmul.f32 %v1525_v55, %v433_v57  ;;  %v431_v0 = vsel %vm430_vm2, %v1523_v46, %v427_v58 }
 0x140   :  { %v582_v6 = vmul.f32 %v431_v0, %v1830_v32 }
 0x141   :  { %v435_v61 = vmul.f32 0.5, %v434_v60  ;;  %v365_v62 = vpop.xlane.xlu1 %364 }
 0x142   :  { %v393_v28 = vmul.f32 0.0078125, %v365_v62  ;;  %v602_v17 = vmul.f32 %v1904_v7, %v582_v6 }
 0x143   :  { %v436_v63 = vsub.f32 1.5, %v435_v61 }
 0x144   :  { %v1527_v1 = vpop.eup %1526  ;;  %v409_v2 = vadd.f32 1e-06, %v393_v28 }
 0x145   :  { %v437_v4 = vmul.f32 %v1525_v55, %v436_v63  ;;  %v443_v5 = vmul.f32 %v1527_v1, %v408_v56  ;;  %vm449_vm6 = vweird.f32 %v1527_v1 }
 0x146   :  { %1528 = vrsqrt.f32 %v409_v2  ;;  %vm450_vm8 = vmor %vm448_vm7, %vm449_vm6  ;;  %vm458_vm10 = vweird.f32 %v409_v2 }
 0x147   :  { %v444_v9 = vmul.f32 %v1527_v1, %v443_v5  ;;  %v441_v11 = vsel %vm440_vm5, %v1525_v55, %v437_v4 }
 0x148   :  { %v583_v29 = vmul.f32 %v441_v11, %v1834_v34 }
 0x149   :  { %v445_v13 = vmul.f32 0.5, %v444_v9  ;;  %v367_v15 = vpop.xlane.xlu2 %366 }
 0x14a   :  { %v394_v16 = vmul.f32 0.0078125, %v367_v15  ;;  %v603_v19 = vmul.f32 %v1904_v7, %v583_v29 }
 0x14b   :  { %v446_v20 = vsub.f32 1.5, %v445_v13 }
 0x14c   :  { %v1529_v21 = vpop.eup %1528  ;;  %v410_v23 = vadd.f32 1e-06, %v394_v16  ;;  %v618_v32 = vpack.c.bf16 %v603_v19, %v602_v17 }
 0x14d   :  { %v453_v24 = vmul.f32 %v1529_v21, %v409_v2  ;;  %v447_v25 = vmul.f32 %v1527_v1, %v446_v20  ;;  %vm459_vm9 = vweird.f32 %v1529_v21 }
 0x14e   :  { %1530 = vrsqrt.f32 %v410_v23  ;;  %698 = vmatmul.bf16.vlgmr.msra.gmra.mxu2 %v618_v32  ;;  %vm460_vm11 = vmor %vm458_vm10, %vm459_vm9  ;;  %vm468_vm13 = vweird.f32 %v410_v23 }
 0x14f   :  { %v454_v33 = vmul.f32 %v1529_v21, %v453_v24  ;;  %v451_v40 = vsel %vm450_vm8, %v1527_v1, %v447_v25 }
 0x150   :  { %v584_v46 = vmul.f32 %v451_v40, %v1838_v36 }
 0x151   :  { %v455_v35 = vmul.f32 0.5, %v454_v33  ;;  %v369_v34 = vpop.xlane.xlu2 %368 }
 0x152   :  { %v395_v37 = vmul.f32 0.0078125, %v369_v34  ;;  %v604_v30 = vmul.f32 %v1904_v7, %v584_v46 }
 0x153   :  { %v456_v39 = vsub.f32 1.5, %v455_v35 }
 0x154   :  { %v1531_v42 = vpop.eup %1530  ;;  %v411_v44 = vadd.f32 1e-06, %v395_v37 }
 0x155   :  { %v457_v27 = vmul.f32 %v1529_v21, %v456_v39  ;;  %v463_v45 = vmul.f32 %v1531_v42, %v410_v23  ;;  %vm469_vm12 = vweird.f32 %v1531_v42 }
 0x156   :  { %1532 = vrsqrt.f32 %v411_v44  ;;  %vm470_vm14 = vmor %vm468_vm13, %vm469_vm12  ;;  %vm478_vm0 = vweird.f32 %v411_v44 }
 0x157   :  { %v464_v47 = vmul.f32 %v1531_v42, %v463_v45  ;;  %v461_v48 = vsel %vm460_vm11, %v1529_v21, %v457_v27 }
 0x158   :  { %v585_v49 = vmul.f32 %v461_v48, %v1842_v38 }
 0x159   :  { %v465_v50 = vmul.f32 0.5, %v464_v47  ;;  %v371_v52 = vpop.xlane.xlu0 %370 }
 0x15a   :  { %v396_v53 = vmul.f32 0.0078125, %v371_v52  ;;  %v605_v54 = vmul.f32 %v1904_v7, %v585_v49 }
 0x15b   :  { %v466_v55 = vsub.f32 1.5, %v465_v50 }
 0x15c   :  { %v1533_v56 = vpop.eup %1532  ;;  %v412_v57 = vadd.f32 1e-06, %v396_v53  ;;  %v619_v58 = vpack.c.bf16 %v605_v54, %v604_v30 }
 0x15d   :  { %v473_v60 = vmul.f32 %v1533_v56, %v411_v44  ;;  %v467_v61 = vmul.f32 %v1531_v42, %v466_v55  ;;  %vm479_vm15 = vweird.f32 %v1533_v56 }
 0x15e   :  { %1534 = vrsqrt.f32 %v412_v57  ;;  %703 = vmatmul.bf16.gmra.mxu2 %v619_v58  ;;  %vm480_vm1 = vmor %vm478_vm0, %vm479_vm15  ;;  %vm488_vm3 = vweird.f32 %v412_v57  ;;  %v1923_v58 = vpop.f32.mrf.mxu1 }
 0x15f   :  { %v474_v36 = vmul.f32 %v1533_v56, %v473_v60  ;;  %v471_v0 = vsel %vm470_vm14, %v1531_v42, %v467_v61 }
 0x160   :  { %v586_v6 = vmul.f32 %v471_v0, %v1846_v43 }
 0x161   :  { %v475_v62 = vmul.f32 0.5, %v474_v36  ;;  %v373_v38 = vpop.xlane.xlu1 %372 }
 0x162   :  { %v397_v28 = vmul.f32 0.0078125, %v373_v38  ;;  %v606_v31 = vmul.f32 %v1904_v7, %v586_v6 }
 0x163   :  { %v476_v63 = vsub.f32 1.5, %v475_v62 }
 0x164   :  { %v1535_v1 = vpop.eup %1534  ;;  %v413_v2 = vadd.f32 1e-06, %v397_v28 }
 0x165   :  { %v477_v4 = vmul.f32 %v1533_v56, %v476_v63  ;;  %v483_v5 = vmul.f32 %v1535_v1, %v412_v57  ;;  %vm489_vm2 = vweird.f32 %v1535_v1 }
 0x166   :  { %1536 = vrsqrt.f32 %v413_v2  ;;  %vm490_vm4 = vmor %vm488_vm3, %vm489_vm2  ;;  %vm498_vm6 = vweird.f32 %v413_v2 }
 0x167   :  { %v484_v9 = vmul.f32 %v1535_v1, %v483_v5  ;;  %v481_v11 = vsel %vm480_vm1, %v1533_v56, %v477_v4 }
 0x168   :  { %v587_v29 = vmul.f32 %v481_v11, %v1850_v51  ;;  %v1927_v11 = vpop.f32.mrf.mxu1 }
 0x169   :  { %v485_v13 = vmul.f32 0.5, %v484_v9  ;;  %v375_v15 = vpop.xlane.xlu2 %374 }
 0x16a   :  { %v398_v16 = vmul.f32 0.0078125, %v375_v15  ;;  %v607_v17 = vmul.f32 %v1904_v7, %v587_v29 }
 0x16b   :  { %v486_v19 = vsub.f32 1.5, %v485_v13 }
 0x16c   :  { %v1537_v20 = vpop.eup %1536  ;;  %v414_v21 = vadd.f32 1e-06, %v398_v16  ;;  %v620_v23 = vpack.c.bf16 %v607_v17, %v606_v31 }
 0x16d   :  { %v493_v32 = vmul.f32 %v1537_v20, %v413_v2  ;;  %v487_v24 = vmul.f32 %v1535_v1, %v486_v19  ;;  %vm499_vm5 = vweird.f32 %v1537_v20 }
 0x16e   :  { %1538 = vrsqrt.f32 %v414_v21  ;;  %708 = vmatmul.bf16.gmra.mxu2 %v620_v23  ;;  %vm500_vm7 = vmor %vm498_vm6, %vm499_vm5  ;;  %vm508_vm9 = vweird.f32 %v414_v21 }
 0x16f   :  { %v494_v43 = vmul.f32 %v1537_v20, %v493_v32  ;;  %v491_v34 = vsel %vm490_vm4, %v1535_v1, %v487_v24 }
 0x170   :  { %v588_v44 = vmul.f32 %v491_v34, %v1854_v59 }
 0x171   :  { %v495_v25 = vmul.f32 0.5, %v494_v43  ;;  %v377_v51 = vpop.xlane.xlu0 %376 }
 0x172   :  { %v399_v33 = vmul.f32 0.0078125, %v377_v51  ;;  %v608_v50 = vmul.f32 %v1904_v7, %v588_v44 }
 0x173   :  { %v496_v35 = vsub.f32 1.5, %v495_v25  ;;  %v1931_v25 = vpop.f32.mrf.mxu1 }
 0x174   :  { %v1539_v37 = vpop.eup %1538  ;;  %v415_v39 = vadd.f32 1e-06, %v399_v33 }
 0x175   :  { %v497_v40 = vmul.f32 %v1537_v20, %v496_v35  ;;  %v503_v42 = vmul.f32 %v1539_v37, %v414_v21  ;;  %vm509_vm8 = vweird.f32 %v1539_v37 }
 0x176   :  { %1540 = vrsqrt.f32 %v415_v39  ;;  %vm510_vm10 = vmor %vm508_vm9, %vm509_vm8  ;;  %vm518_vm12 = vweird.f32 %v415_v39 }
 0x177   :  { %v504_v27 = vmul.f32 %v1539_v37, %v503_v42  ;;  %v501_v45 = vsel %vm500_vm7, %v1537_v20, %v497_v40 }
 0x178   :  { %v589_v46 = vmul.f32 %v501_v45, %v1858_v3 }
 0x179   :  { %v505_v47 = vmul.f32 0.5, %v504_v27  ;;  %v379_v48 = vpop.xlane.xlu1 %378 }
 0x17a   :  { %v400_v49 = vmul.f32 0.0078125, %v379_v48  ;;  %v609_v52 = vmul.f32 %v1904_v7, %v589_v46 }
 0x17b   :  { %v506_v53 = vsub.f32 1.5, %v505_v47 }
 0x17c   :  { %v1541_v30 = vpop.eup %1540  ;;  %v416_v54 = vadd.f32 1e-06, %v400_v49  ;;  %v621_v55 = vpack.c.bf16 %v609_v52, %v608_v50 }
 0x17d   :  { %v513_v56 = vmul.f32 %v1541_v30, %v415_v39  ;;  %v507_v57 = vmul.f32 %v1539_v37, %v506_v53  ;;  %vm519_vm11 = vweird.f32 %v1541_v30 }
 0x17e   :  { %1542 = vrsqrt.f32 %v416_v54  ;;  %713 = vmatmul.bf16.gmra.mxu2 %v621_v55  ;;  %vm520_vm13 = vmor %vm518_vm12, %vm519_vm11  ;;  %vm528_vm15 = vweird.f32 %v416_v54  ;;  %v1463_v55 = vld [vmem:[#allocation8 + $0x30] sm:$0xff] }
 0x17f   :  { %v514_v59 = vmul.f32 %v1541_v30, %v513_v56  ;;  %v511_v62 = vsel %vm510_vm10, %v1539_v37, %v507_v57 }
 0x180   :  { %v590_v1 = vmul.f32 %v511_v62, %v1863_v8 }
 0x181   :  { %v515_v3 = vmul.f32 0.5, %v514_v59  ;;  %v381_v60 = vpop.xlane.xlu2 %380 }
 0x182   :  { %v401_v61 = vmul.f32 0.0078125, %v381_v60  ;;  %v610_v13 = vmul.f32 %v1904_v7, %v590_v1 }
 0x183   :  { %v516_v36 = vsub.f32 1.5, %v515_v3 }
 0x184   :  { %v1543_v38 = vpop.eup %1542  ;;  %v417_v28 = vadd.f32 1e-06, %v401_v61 }
 0x185   :  { %v517_v63 = vmul.f32 %v1541_v30, %v516_v36  ;;  %v523_v0 = vmul.f32 %v1543_v38, %v416_v54  ;;  %vm529_vm14 = vweird.f32 %v1543_v38  ;;  %v1464_v54 = vld [vmem:[#allocation8 + $0x38] sm:$0xff] }
 0x186   :  { %1544 = vrsqrt.f32 %v417_v28  ;;  %vm530_vm0 = vmor %vm528_vm15, %vm529_vm14  ;;  %vm538_vm2 = vweird.f32 %v417_v28  ;;  %1147 = vmatpush.bf16.msra.mxu3 %v1464_v54 }
 0x187   :  { %v524_v2 = vmul.f32 %v1543_v38, %v523_v0  ;;  %v521_v4 = vsel %vm520_vm13, %v1541_v30, %v517_v63  ;;  %v1937_v30 = vpop.f32.mrf.mxu1  ;;  %v1377_v0 = vmul.f32 -1.442695, %v1923_v58 }
 0x188   :  { %v591_v5 = vmul.f32 %v521_v4, %v1867_v10 }
 0x189   :  { %v525_v6 = vmul.f32 0.5, %v524_v2  ;;  %v383_v9 = vpop.xlane.xlu0 %382 }
 0x18a   :  { %v402_v29 = vmul.f32 0.0078125, %v383_v9  ;;  %v611_v15 = vmul.f32 %v1904_v7, %v591_v5  ;;  %1148 = vmatpush.bf16.msra.mxu3 %v1463_v55  ;;  %v1378_v5 = vmul.f32 -1.442695, %v1927_v11 }
 0x18b   :  { %v526_v16 = vsub.f32 1.5, %v525_v6 }
 0x18c   :  { %v1545_v31 = vpop.eup %1544  ;;  %v418_v17 = vadd.f32 1e-06, %v402_v29  ;;  %v622_v19 = vpack.c.bf16 %v611_v15, %v610_v13  ;;  %v1461_v29 = vld [vmem:[#allocation8 + $0x20] sm:$0xff] }
 0x18d   :  { %v533_v20 = vmul.f32 %v1545_v31, %v417_v28  ;;  %v527_v8 = vmul.f32 %v1543_v38, %v526_v16  ;;  %vm539_vm1 = vweird.f32 %v1545_v31  ;;  %v1462_v28 = vld [vmem:[#allocation8 + $0x28] sm:$0xff] }
 0x18e   :  { %1546 = vrsqrt.f32 %v418_v17  ;;  %718 = vmatmul.bf16.gmra.mxu2 %v622_v19  ;;  %vm540_vm3 = vmor %vm538_vm2, %vm539_vm1  ;;  %vm548_vm5 = vweird.f32 %v418_v17  ;;  %1149 = vmatpush.bf16.msra.mxu3 %v1462_v28  ;;  %v1460_v19 = vld [vmem:[#allocation8 + $0x18] sm:$0xff] }
 0x18f   :  { %v534_v21 = vmul.f32 %v1545_v31, %v533_v20  ;;  %v531_v43 = vsel %vm530_vm0, %v1543_v38, %v527_v8  ;;  %v1941_v4 = vpop.f32.mrf.mxu1 }
 0x190   :  { %v592_v37 = vmul.f32 %v531_v43, %v1872_v12 }
 0x191   :  { %v535_v10 = vmul.f32 0.5, %v534_v21  ;;  %v385_v23 = vpop.xlane.xlu1 %384 }
 0x192   :  { %v403_v32 = vmul.f32 0.0078125, %v385_v23  ;;  %v612_v46 = vmul.f32 %v1904_v7, %v592_v37  ;;  %1150 = vmatpush.bf16.msra.mxu3 %v1461_v29  ;;  %v1459_v23 = vld [vmem:[#allocation8 + $0x10] sm:$0xff] }
 0x193   :  { %v536_v24 = vsub.f32 1.5, %v535_v10 }
 0x194   :  { %v1547_v51 = vpop.eup %1546  ;;  %v419_v33 = vadd.f32 1e-06, %v403_v32 }
 0x195   :  { %v537_v35 = vmul.f32 %v1545_v31, %v536_v24  ;;  %v543_v34 = vmul.f32 %v1547_v51, %v418_v17  ;;  %vm549_vm4 = vweird.f32 %v1547_v51 }
 0x196   :  { %1548 = vrsqrt.f32 %v419_v33  ;;  %vm550_vm6 = vmor %vm548_vm5, %vm549_vm4  ;;  %vm558_vm8 = vweird.f32 %v419_v33  ;;  %1151 = vmatpush.bf16.msra.mxu3 %v1460_v19 }
 0x197   :  { %v544_v39 = vmul.f32 %v1547_v51, %v543_v34  ;;  %v541_v40 = vsel %vm540_vm3, %v1545_v31, %v537_v35  ;;  %v1947_v10 = vpop.f32.mrf.mxu1  ;;  %v1458_v34 = vld [vmem:[#allocation8 + $0x8] sm:$0xff] }
 0x198   :  { %v593_v42 = vmul.f32 %v541_v40, %v1876_v14 }
 0x199   :  { %v545_v44 = vmul.f32 0.5, %v544_v39  ;;  %v387_v27 = vpop.xlane.xlu2 %386  ;;  %v1379_v39 = vmul.f32 -1.442695, %v1931_v25 }
 0x19a   :  { %v404_v45 = vmul.f32 0.0078125, %v387_v27  ;;  %v613_v47 = vmul.f32 %v1904_v7, %v593_v42  ;;  %1152 = vmatpush.bf16.msra.mxu3 %v1459_v23  ;;  %v1380_v42 = vmul.f32 -1.442695, %v1937_v30  ;;  %v1457_v27 = vld [vmem:[#allocation8] sm:$0xff] }
 0x19b   :  { %v546_v48 = vsub.f32 1.5, %v545_v44 }
 0x19c   :  { %v1549_v49 = vpop.eup %1548  ;;  %v420_v50 = vadd.f32 1e-06, %v404_v45  ;;  %v623_v52 = vpack.c.bf16 %v613_v47, %v612_v46 }
 0x19d   :  { %v553_v53 = vmul.f32 %v1549_v49, %v419_v33  ;;  %v547_v12 = vmul.f32 %v1547_v51, %v546_v48  ;;  %vm559_vm7 = vweird.f32 %v1549_v49 }
 0x19e   :  { %1550 = vrsqrt.f32 %v420_v50  ;;  %723 = vmatmul.bf16.gmra.mxu2 %v623_v52  ;;  %vm560_vm9 = vmor %vm558_vm8, %vm559_vm7  ;;  %vm568_vm11 = vweird.f32 %v420_v50  ;;  %1153 = vmatpush.bf16.msra.mxu3 %v1458_v34 }
 0x19f   :  { %v554_v14 = vmul.f32 %v1549_v49, %v553_v53  ;;  %v551_v60 = vsel %vm550_vm6, %v1547_v51, %v547_v12  ;;  %v1955_v47 = vpop.f32.mrf.mxu1 }
 0x1a0   :  { %v594_v63 = vmul.f32 %v551_v60, %v1881_v18 }
 0x1a1   :  { %v555_v56 = vmul.f32 0.5, %v554_v14  ;;  %v389_v57 = vpop.xlane.xlu0 %388 }
 0x1a2   :  { %v405_v59 = vmul.f32 0.0078125, %v389_v57  ;;  %v614_v13 = vmul.f32 %v1904_v7, %v594_v63  ;;  %1154 = vmatpush.bf16.msra.mxu3 %v1457_v27  ;;  %v1382_v57 = vmul.f32 -1.442695, %v1947_v10 }
 0x1a3   :  { %v556_v3 = vsub.f32 1.5, %v555_v56  ;;  %v1381_v56 = vmul.f32 -1.442695, %v1941_v4 }
 0x1a4   :  { %v1551_v61 = vpop.eup %1550  ;;  %v421_v36 = vadd.f32 1e-06, %v405_v59 }
 0x1a5   :  { %v557_v62 = vmul.f32 %v1549_v49, %v556_v3  ;;  %v563_v38 = vmul.f32 %v1551_v61, %v420_v50  ;;  %vm569_vm10 = vweird.f32 %v1551_v61 }
 0x1a6   :  { %1552 = vrsqrt.f32 %v421_v36  ;;  %vm570_vm12 = vmor %vm568_vm11, %vm569_vm10  ;;  %vm578_vm14 = vweird.f32 %v421_v36 }
 0x1a7   :  { %v564_v1 = vmul.f32 %v1551_v61, %v563_v38  ;;  %v561_v2 = vsel %vm560_vm9, %v1549_v49, %v557_v62  ;;  %1554 = vpow2.f32 %v1377_v0  ;;  %v1961_v14 = vpop.f32.mrf.mxu1 }
 0x1a8   :  { %v595_v6 = vmul.f32 %v561_v2, %v1885_v22  ;;  %1556 = vpow2.f32 %v1378_v5 }
 0x1a9   :  { %v565_v9 = vmul.f32 0.5, %v564_v1 }
 0x1aa   :  { %v615_v15 = vmul.f32 %v1904_v7, %v595_v6 }
 0x1ab   :  { %v566_v16 = vsub.f32 1.5, %v565_v9 }
 0x1ac   :  { %v1553_v18 = vpop.eup %1552  ;;  %v624_v31 = vpack.c.bf16 %v615_v15, %v614_v13 }
 0x1ad   :  { %v573_v17 = vmul.f32 %v1553_v18, %v421_v36  ;;  %v567_v20 = vmul.f32 %v1551_v61, %v566_v16  ;;  %v1555_v22 = vpop.eup %1554  ;;  %vm579_vm13 = vweird.f32 %v1553_v18 }
 0x1ae   :  { %728 = vmatmul.bf16.gmra.mxu2 %v624_v31  ;;  %v1557_v32 = vpop.eup %1556  ;;  %v787_v51 = vadd.f32 1.0, %v1555_v22  ;;  %vm580_vm15 = vmor %vm578_vm14, %vm579_vm13 }
 0x1af   :  { %v574_v8 = vmul.f32 %v1553_v18, %v573_v17  ;;  %v571_v43 = vsel %vm570_vm12, %v1551_v61, %v567_v20  ;;  %v788_v33 = vadd.f32 1.0, %v1557_v32  ;;  %v1979_v5 = vpop.f32.mrf.mxu1  ;;  %v1383_v32 = vmul.f32 -1.442695, %v1955_v47 }
 0x1b0   :  { %v596_v37 = vmul.f32 %v571_v43, %v1890_v26  ;;  %1558 = vrcp.f32 %v787_v51  ;;  %vm808_vm0 = vweird.f32 %v787_v51  ;;  %v812_v60 = vand.u32 2147483647, %v787_v51 }
 0x1b1   :  { %v575_v21 = vmul.f32 0.5, %v574_v8  ;;  %1560 = vrcp.f32 %v788_v33  ;;  %vm823_vm2 = vweird.f32 %v788_v33  ;;  %v814_v61 = vand.u32 2147483648, %v787_v51 }
 0x1b2   :  { %v616_v45 = vmul.f32 %v1904_v7, %v596_v37  ;;  %1562 = vpow2.f32 %v1379_v39  ;;  %v827_v36 = vand.u32 2147483647, %v788_v33  ;;  %v829_v62 = vand.u32 2147483648, %v788_v33 }
 0x1b3   :  { %v576_v24 = vsub.f32 1.5, %v575_v21  ;;  %1564 = vpow2.f32 %v1380_v42  ;;  %vm813_vm6 = vcmp.eq.f32.partialorder %v812_v60, 8.507059e+37  ;;  %v815_v9 = vor.u32 1.1754944e-38, %v814_v61 }
 0x1b4   :  { %vm828_vm7 = vcmp.eq.f32.partialorder %v827_v36, 8.507059e+37  ;;  %v830_v29 = vor.u32 1.1754944e-38, %v829_v62 }
 0x1b5   :  { %v577_v35 = vmul.f32 %v1553_v18, %v576_v24 }
 0x1b6   :  { %v1559_v48 = vpop.eup %1558 }
 0x1b7   :  { %v581_v40 = vsel %vm580_vm15, %v1553_v18, %v577_v35  ;;  %v1561_v49 = vpop.eup %1560  ;;  %v804_v53 = vmul.f32 %v1559_v48, %v787_v51  ;;  %vm809_vm1 = vweird.f32 %v1559_v48  ;;  %v1384_v51 = vmul.f32 -1.442695, %v1961_v14 }
 0x1b8   :  { %v597_v44 = vmul.f32 %v581_v40, %v1894_v41  ;;  %v1563_v50 = vpop.eup %1562  ;;  %v819_v54 = vmul.f32 %v1561_v49, %v788_v33  ;;  %vm824_vm3 = vweird.f32 %v1561_v49  ;;  %vm1969_vm4 = vmor %vm808_vm0, %vm809_vm1  ;;  %v1999_v33 = vpop.f32.mrf.mxu1 }
 0x1b9   :  { %v1565_v52 = vpop.eup %1564  ;;  %v1957_v41 = vadd.f32 1.0, %v1563_v50  ;;  %vm1975_vm5 = vmor %vm823_vm2, %vm824_vm3 }
 0x1ba   :  { %v617_v46 = vmul.f32 %v1904_v7, %v597_v44  ;;  %v1959_v12 = vadd.f32 1.0, %v1565_v52  ;;  %v805_v7 = vsub.f32 1.0, %v804_v53  ;;  %v820_v55 = vsub.f32 1.0, %v819_v54 }
 0x1bb   :  { %1566 = vrcp.f32 %v1957_v41  ;;  %vm838_vm8 = vweird.f32 %v1957_v41  ;;  %v844_v42 = vand.u32 2147483648, %v1957_v41 }
 0x1bc   :  { %v625_v26 = vpack.c.bf16 %v617_v46, %v616_v45  ;;  %1568 = vrcp.f32 %v1959_v12  ;;  %v806_v59 = vmul.f32 %v1559_v48, %v805_v7  ;;  %v821_v3 = vmul.f32 %v1561_v49, %v820_v55 }
 0x1bd   :  { %1570 = vpow2.f32 %v1381_v56  ;;  %vm853_vm10 = vweird.f32 %v1959_v12  ;;  %v857_v44 = vand.u32 2147483647, %v1959_v12  ;;  %v859_v27 = vand.u32 2147483648, %v1959_v12 }
 0x1be   :  { %733 = vmatmul.bf16.gmra.mxu2 %v625_v26  ;;  %1572 = vpow2.f32 %v1382_v57  ;;  %v807_v28 = vadd.f32 %v1559_v48, %v806_v59  ;;  %v822_v0 = vadd.f32 %v1561_v49, %v821_v3  ;;  %v845_v53 = vor.u32 1.1754944e-38, %v844_v42 }
 0x1bf   :  { %vm858_vm15 = vcmp.eq.f32.partialorder %v857_v44, 8.507059e+37  ;;  %v860_v54 = vor.u32 1.1754944e-38, %v859_v27 }
 0x1c0   :  { %v811_v16 = vsel %vm1969_vm4, %v1559_v48, %v807_v28  ;;  %v826_v18 = vsel %vm1975_vm5, %v1561_v49, %v822_v0  ;;  %v2035_v59 = vpop.f32.mrf.mxu1  ;;  %v1385_v28 = vmul.f32 -1.442695, %v1979_v5 }
 0x1c1   :  { %v1967_v38 = vpop.eup %1566  ;;  %v816_v20 = vsel %vm813_vm6, %v815_v9, %v811_v16  ;;  %v831_v8 = vsel %vm828_vm7, %v830_v29, %v826_v18  ;;  %v1387_v27 = vmul.f32 -1.442695, %v2035_v59 }
 0x1c2   :  { %v1973_v1 = vpop.eup %1568  ;;  %v834_v31 = vmul.f32 %v1967_v38, %v1957_v41  ;;  %v1043_v24 = vmul.f32 %v816_v20, %v1923_v58  ;;  %v1044_v43 = vmul.f32 %v831_v8, %v1927_v11  ;;  %vm839_vm9 = vweird.f32 %v1967_v38 }
 0x1c3   :  { %v1571_v6 = vpop.eup %1570  ;;  %v849_v17 = vmul.f32 %v1973_v1, %v1959_v12  ;;  %vm854_vm11 = vweird.f32 %v1973_v1  ;;  %v842_v11 = vand.u32 2147483647, %v1957_v41  ;;  %vm2014_vm12 = vmor %vm838_vm8, %vm839_vm9 }
 0x1c4   :  { %v1573_v15 = vpop.eup %1572  ;;  %v1989_v19 = vadd.f32 1.0, %v1571_v6  ;;  %v835_v21 = vsub.f32 1.0, %v834_v31  ;;  %vm2021_vm13 = vmor %vm853_vm10, %vm854_vm11 }
 0x1c5   :  { %v1991_v22 = vadd.f32 1.0, %v1573_v15  ;;  %v850_v23 = vsub.f32 1.0, %v849_v17  ;;  %vm843_vm14 = vcmp.eq.f32.partialorder %v842_v11, 8.507059e+37 }
 0x1c6   :  { %1574 = vrcp.f32 %v1989_v19  ;;  %v836_v34 = vmul.f32 %v1967_v38, %v835_v21  ;;  %vm868_vm0 = vweird.f32 %v1989_v19  ;;  %v874_v15 = vand.u32 2147483648, %v1989_v19 }
 0x1c7   :  { %1576 = vrcp.f32 %v1991_v22  ;;  %v851_v37 = vmul.f32 %v1973_v1, %v850_v23  ;;  %vm883_vm2 = vweird.f32 %v1991_v22  ;;  %v889_v16 = vand.u32 2147483648, %v1991_v22 }
 0x1c8   :  { %1578 = vpow2.f32 %v1383_v32  ;;  %v837_v46 = vadd.f32 %v1967_v38, %v836_v34  ;;  %v2056_v18 = vpop.f32.mrf.mxu1  ;;  %v887_v21 = vand.u32 2147483647, %v1991_v22  ;;  %v875_v32 = vor.u32 1.1754944e-38, %v874_v15 }
 0x1c9   :  { %1580 = vpow2.f32 %v1384_v51  ;;  %v852_v48 = vadd.f32 %v1973_v1, %v851_v37 }
 0x1ca   :  { %v841_v7 = vsel %vm2014_vm12, %v1967_v38, %v837_v46  ;;  %vm888_vm7 = vcmp.eq.f32.partialorder %v887_v21, 8.507059e+37 }
 0x1cb   :  { %v856_v55 = vsel %vm2021_vm13, %v1973_v1, %v852_v48  ;;  %v846_v60 = vsel %vm843_vm14, %v845_v53, %v841_v7  ;;  %v1386_v1 = vmul.f32 -1.442695, %v1999_v33  ;;  %v1388_v48 = vmul.f32 -1.442695, %v2056_v18 }
 0x1cc   :  { %v2011_v45 = vpop.eup %1574  ;;  %v861_v61 = vsel %vm858_vm15, %v860_v54, %v856_v55  ;;  %v1045_v63 = vmul.f32 %v846_v60, %v1931_v25 }
 0x1cd   :  { %v2019_v49 = vpop.eup %1576  ;;  %v864_v56 = vmul.f32 %v2011_v45, %v1989_v19  ;;  %v1046_v0 = vmul.f32 %v861_v61, %v1937_v30  ;;  %vm869_vm1 = vweird.f32 %v2011_v45  ;;  %v872_v30 = vand.u32 2147483647, %v1989_v19 }
 0x1ce   :  { %v1579_v52 = vpop.eup %1578  ;;  %v879_v57 = vmul.f32 %v2019_v49, %v1991_v22  ;;  %vm884_vm3 = vweird.f32 %v2019_v49  ;;  %vm2061_vm4 = vmor %vm868_vm0, %vm869_vm1 }
 0x1cf   :  { %v1581_v12 = vpop.eup %1580  ;;  %v2037_v3 = vadd.f32 1.0, %v1579_v52  ;;  %v865_v62 = vsub.f32 1.0, %v864_v56  ;;  %vm885_vm5 = vmor %vm883_vm2, %vm884_vm3  ;;  %vm873_vm6 = vcmp.eq.f32.partialorder %v872_v30, 8.507059e+37 }
 0x1d0   :  { %v2039_v36 = vadd.f32 1.0, %v1581_v12  ;;  %v880_v38 = vsub.f32 1.0, %v879_v57  ;;  %v2084_v46 = vpop.f32.mrf.mxu1 }
 0x1d1   :  { %v699_v13 = vpop.f32.mrf.mxu2  ;;  %1582 = vrcp.f32 %v2037_v3  ;;  %v866_v6 = vmul.f32 %v2011_v45, %v865_v62  ;;  %vm898_vm8 = vweird.f32 %v2037_v3  ;;  %v904_v12 = vand.u32 2147483648, %v2037_v3 }
 0x1d2   :  { %v1059_v39 = vmul.f32 %v1043_v24, %v699_v13  ;;  %1584 = vrcp.f32 %v2039_v36  ;;  %v881_v9 = vmul.f32 %v2019_v49, %v880_v38  ;;  %v890_v24 = vor.u32 1.1754944e-38, %v889_v16 }
 0x1d3   :  { %1586 = vpow2.f32 %v1385_v28  ;;  %v867_v17 = vadd.f32 %v2011_v45, %v866_v6  ;;  %vm913_vm10 = vweird.f32 %v2039_v36  ;;  %v919_v7 = vand.u32 2147483648, %v2039_v36 }
 0x1d4   :  { %1588 = vpow2.f32 %v1386_v1  ;;  %v882_v8 = vadd.f32 %v2019_v49, %v881_v9  ;;  %v917_v60 = vand.u32 2147483647, %v2039_v36  ;;  %v905_v28 = vor.u32 1.1754944e-38, %v904_v12 }
 0x1d5   :  { %v871_v34 = vsel %vm2061_vm4, %v2011_v45, %v867_v17 }
 0x1d6   :  { %v886_v37 = vsel %vm885_vm5, %v2019_v49, %v882_v8  ;;  %vm918_vm15 = vcmp.eq.f32.partialorder %v917_v60, 8.507059e+37 }
 0x1d7   :  { %v2058_v31 = vpop.eup %1582 }
 0x1d8   :  { %v2067_v23 = vpop.eup %1584  ;;  %vm899_vm9 = vweird.f32 %v2058_v31 }
 0x1d9   :  { %v701_v35 = vpop.f32.mrf.mxu2  ;;  %v1587_v19 = vpop.eup %1586  ;;  %v909_v22 = vmul.f32 %v2067_v23, %v2039_v36  ;;  %vm914_vm11 = vweird.f32 %v2067_v23  ;;  %vm2103_vm12 = vmor %vm898_vm8, %vm899_vm9 }
 0x1da   :  { %v1060_v40 = vmul.f32 %v1044_v43, %v701_v35  ;;  %v894_v43 = vmul.f32 %v2058_v31, %v2037_v3  ;;  %v1589_v35 = vpop.eup %1588  ;;  %vm2111_vm13 = vmor %vm913_vm10, %vm914_vm11 }
 0x1db   :  { %v2081_v42 = vadd.f32 1.0, %v1589_v35  ;;  %v910_v44 = vsub.f32 1.0, %v909_v22 }
 0x1dc   :  { %v1075_v58 = vpack.c.bf16 %v1060_v40, %v1059_v39  ;;  %v2079_v39 = vadd.f32 1.0, %v1587_v19  ;;  %v876_v40 = vsel %vm873_vm6, %v875_v32, %v871_v34  ;;  %v895_v11 = vsub.f32 1.0, %v894_v43 }
 0x1dd   :  { %v1047_v45 = vmul.f32 %v876_v40, %v1941_v4  ;;  %v911_v52 = vmul.f32 %v2067_v23, %v910_v44  ;;  %vm943_vm2 = vweird.f32 %v2081_v42  ;;  %v947_v35 = vand.u32 2147483647, %v2081_v42 }
 0x1de   :  { %1155 = vmatmul.bf16.vlgmr.msra.gmra.mxu3 %v1075_v58  ;;  %v891_v58 = vsel %vm888_vm7, %v890_v24, %v886_v37  ;;  %1590 = vrcp.f32 %v2079_v39  ;;  %v896_v49 = vmul.f32 %v2058_v31, %v895_v11  ;;  %vm928_vm0 = vweird.f32 %v2079_v39 }
 0x1df   :  { %v1048_v26 = vmul.f32 %v891_v58, %v1947_v10  ;;  %1592 = vrcp.f32 %v2081_v42  ;;  %v912_v57 = vadd.f32 %v2067_v23, %v911_v52  ;;  %v932_v43 = vand.u32 2147483647, %v2079_v39 }
 0x1e0   :  { %1594 = vpow2.f32 %v1387_v27  ;;  %v897_v10 = vadd.f32 %v2058_v31, %v896_v49  ;;  %v949_v34 = vand.u32 2147483648, %v2081_v42  ;;  %vm948_vm7 = vcmp.eq.f32.partialorder %v947_v35, 8.507059e+37 }
 0x1e1   :  { %v704_v41 = vpop.f32.mrf.mxu2  ;;  %1596 = vpow2.f32 %v1388_v48  ;;  %v916_v36 = vsel %vm2111_vm13, %v2067_v23, %v912_v57  ;;  %vm933_vm6 = vcmp.eq.f32.partialorder %v932_v43, 8.507059e+37 }
 0x1e2   :  { %v1061_v29 = vmul.f32 %v1045_v63, %v704_v41  ;;  %v902_v41 = vand.u32 2147483647, %v2037_v3  ;;  %v901_v38 = vsel %vm2103_vm12, %v2058_v31, %v897_v10  ;;  %v920_v63 = vor.u32 1.1754944e-38, %v919_v7 }
 0x1e3   :  { %v1389_v31 = vmul.f32 -1.442695, %v2084_v46  ;;  %v950_v27 = vor.u32 1.1754944e-38, %v949_v34 }
 0x1e4   :  { %v2101_v55 = vpop.eup %1590  ;;  %vm903_vm14 = vcmp.eq.f32.partialorder %v902_v41, 8.507059e+37 }
 0x1e5   :  { %v2109_v61 = vpop.eup %1592  ;;  %v924_v6 = vmul.f32 %v2101_v55, %v2079_v39  ;;  %vm929_vm1 = vweird.f32 %v2101_v55 }
 0x1e6   :  { %v1595_v3 = vpop.eup %1594  ;;  %v939_v9 = vmul.f32 %v2109_v61, %v2081_v42  ;;  %vm944_vm3 = vweird.f32 %v2109_v61  ;;  %vm2152_vm4 = vmor %vm928_vm0, %vm929_vm1 }
 0x1e7   :  { %v925_v15 = vsub.f32 1.0, %v924_v6  ;;  %vm945_vm5 = vmor %vm943_vm2, %vm944_vm3 }
 0x1e8   :  { %v940_v16 = vsub.f32 1.0, %v939_v9 }
 0x1e9   :  { %v706_v2 = vpop.f32.mrf.mxu2  ;;  %v926_v23 = vmul.f32 %v2101_v55, %v925_v15 }
 0x1ea   :  { %v1062_v13 = vmul.f32 %v1046_v0, %v706_v2  ;;  %v2118_v0 = vpop.f32.mrf.mxu1  ;;  %v1597_v2 = vpop.eup %1596  ;;  %v941_v19 = vmul.f32 %v2109_v61, %v940_v16 }
 0x1eb   :  { %v2129_v30 = vadd.f32 1.0, %v1597_v2  ;;  %v1390_v8 = vmul.f32 -1.442695, %v2118_v0  ;;  %v927_v22 = vadd.f32 %v2101_v55, %v926_v23 }
 0x1ec   :  { %v1076_v25 = vpack.c.bf16 %v1062_v13, %v1061_v29  ;;  %v2127_v29 = vadd.f32 1.0, %v1595_v3  ;;  %v906_v13 = vsel %vm903_vm14, %v905_v28, %v901_v38  ;;  %v942_v58 = vadd.f32 %v2109_v61, %v941_v19 }
 0x1ed   :  { %v1049_v17 = vmul.f32 %v906_v13, %v1955_v47  ;;  %vm973_vm10 = vweird.f32 %v2129_v30 }
 0x1ee   :  { %1160 = vmatmul.bf16.gmra.mxu3 %v1076_v25  ;;  %v921_v25 = vsel %vm918_vm15, %v920_v63, %v916_v36  ;;  %1598 = vrcp.f32 %v2127_v29  ;;  %v946_v48 = vsel %vm945_vm5, %v2109_v61, %v942_v58  ;;  %vm958_vm8 = vweird.f32 %v2127_v29 }
 0x1ef   :  { %v1050_v20 = vmul.f32 %v921_v25, %v1961_v14  ;;  %1600 = vrcp.f32 %v2129_v30  ;;  %v964_v28 = vand.u32 2147483648, %v2127_v29  ;;  %v977_v63 = vand.u32 2147483647, %v2129_v30 }
 0x1f0   :  { %1602 = vpow2.f32 %v1389_v31 }
 0x1f1   :  { %v709_v51 = vpop.f32.mrf.mxu2  ;;  %1604 = vpow2.f32 %v1390_v8  ;;  %v965_v15 = vor.u32 1.1754944e-38, %v964_v28  ;;  %vm978_vm15 = vcmp.eq.f32.partialorder %v977_v63, 8.507059e+37 }
 0x1f2   :  { %v1063_v53 = vmul.f32 %v1047_v45, %v709_v51  ;;  %v2141_v47 = vpop.f32.mrf.mxu1  ;;  %v934_v51 = vand.u32 2147483648, %v2079_v39 }
 0x1f3   :  { %v1391_v7 = vmul.f32 -1.442695, %v2141_v47 }
 0x1f4   :  { %v2149_v37 = vpop.eup %1598  ;;  %v935_v39 = vor.u32 1.1754944e-38, %v934_v51 }
 0x1f5   :  { %v2157_v11 = vpop.eup %1600  ;;  %v954_v49 = vmul.f32 %v2149_v37, %v2127_v29  ;;  %vm959_vm9 = vweird.f32 %v2149_v37 }
 0x1f6   :  { %v1603_v44 = vpop.eup %1602  ;;  %vm974_vm11 = vweird.f32 %v2157_v11  ;;  %vm2190_vm12 = vmor %vm958_vm8, %vm959_vm9 }
 0x1f7   :  { %v1605_v45 = vpop.eup %1604  ;;  %v2167_v52 = vadd.f32 1.0, %v1603_v44  ;;  %v955_v41 = vsub.f32 1.0, %v954_v49  ;;  %vm975_vm13 = vmor %vm973_vm10, %vm974_vm11 }
 0x1f9   :  { %v711_v50 = vpop.f32.mrf.mxu2  ;;  %1606 = vrcp.f32 %v2167_v52  ;;  %v956_v61 = vmul.f32 %v2149_v37, %v955_v41  ;;  %vm988_vm0 = vweird.f32 %v2167_v52 }
 0x1fa   :  { %v1064_v54 = vmul.f32 %v1048_v26, %v711_v50  ;;  %v931_v26 = vsel %vm2152_vm4, %v2101_v55, %v927_v22  ;;  %v969_v50 = vmul.f32 %v2157_v11, %v2129_v30  ;;  %v2171_v10 = vpop.f32.mrf.mxu1 }
 0x1fb   :  { %v1392_v57 = vmul.f32 -1.442695, %v2171_v10  ;;  %v957_v36 = vadd.f32 %v2149_v37, %v956_v61 }
 0x1fc   :  { %v1077_v4 = vpack.c.bf16 %v1064_v54, %v1063_v53  ;;  %v936_v53 = vsel %vm933_vm6, %v935_v39, %v931_v26  ;;  %v951_v54 = vsel %vm948_vm7, %v950_v27, %v946_v48  ;;  %v970_v12 = vsub.f32 1.0, %v969_v50 }
 0x1fd   :  { %v1051_v55 = vmul.f32 %v936_v53, %v1979_v5  ;;  %v1052_v56 = vmul.f32 %v951_v54, %v1999_v33  ;;  %v962_v33 = vand.u32 2147483647, %v2127_v29 }
 0x1fe   :  { %1165 = vmatmul.bf16.gmra.mxu3 %v1077_v4  ;;  %v2169_v4 = vadd.f32 1.0, %v1605_v45  ;;  %v971_v62 = vmul.f32 %v2157_v11, %v970_v12 }
 0x1ff   :  { %v1607_v2 = vpop.eup %1606  ;;  %vm963_vm14 = vcmp.eq.f32.partialorder %v962_v33, 8.507059e+37 }
 0x200   :  { %1608 = vrcp.f32 %v2169_v4  ;;  %v972_v9 = vadd.f32 %v2157_v11, %v971_v62  ;;  %vm989_vm1 = vweird.f32 %v1607_v2  ;;  %vm1003_vm2 = vweird.f32 %v2169_v4 }
 0x201   :  { %v714_v1 = vpop.f32.mrf.mxu2  ;;  %1610 = vpow2.f32 %v1391_v7  ;;  %v1009_v44 = vand.u32 2147483648, %v2169_v4  ;;  %vm990_vm4 = vmor %vm988_vm0, %vm989_vm1 }
 0x202   :  { %v1065_v32 = vmul.f32 %v1049_v17, %v714_v1  ;;  %1612 = vpow2.f32 %v1392_v57  ;;  %v979_v1 = vand.u32 2147483648, %v2129_v30  ;;  %v961_v30 = vsel %vm2190_vm12, %v2149_v37, %v957_v36 }
 0x203   :  { %v976_v17 = vsel %vm975_vm13, %v2157_v11, %v972_v9  ;;  %v966_v23 = vsel %vm963_vm14, %v965_v15, %v961_v30  ;;  %v1007_v11 = vand.u32 2147483647, %v2169_v4  ;;  %v1010_v48 = vor.u32 1.1754944e-38, %v1009_v44 }
 0x204   :  { %v980_v29 = vor.u32 1.1754944e-38, %v979_v1  ;;  %v1053_v43 = vmul.f32 %v966_v23, %v2035_v59  ;;  %v992_v59 = vand.u32 2147483647, %v2167_v52 }
 0x205   :  { %vm1008_vm7 = vcmp.eq.f32.partialorder %v1007_v11, 8.507059e+37 }
 0x206   :  { %v1609_v13 = vpop.eup %1608  ;;  %v981_v19 = vsel %vm978_vm15, %v980_v29, %v976_v17  ;;  %vm993_vm6 = vcmp.eq.f32.partialorder %v992_v59, 8.507059e+37 }
 0x207   :  { %v1611_v25 = vpop.eup %1610  ;;  %v999_v8 = vmul.f32 %v1609_v13, %v2169_v4  ;;  %v1054_v51 = vmul.f32 %v981_v19, %v2056_v18  ;;  %vm1004_vm3 = vweird.f32 %v1609_v13  ;;  %v994_v18 = vand.u32 2147483648, %v2167_v52 }
 0x208   :  { %v1613_v31 = vpop.eup %1612  ;;  %vm1005_vm5 = vmor %vm1003_vm2, %vm1004_vm3 }
 0x209   :  { %v716_v21 = vpop.f32.mrf.mxu2  ;;  %v995_v26 = vor.u32 1.1754944e-38, %v994_v18 }
 0x20a   :  { %v1066_v24 = vmul.f32 %v1050_v20, %v716_v21  ;;  %v984_v20 = vmul.f32 %v1607_v2, %v2167_v52  ;;  %v2201_v21 = vadd.f32 1.0, %v1611_v25 }
 0x20c   :  { %v1078_v14 = vpack.c.bf16 %v1066_v24, %v1065_v32  ;;  %v2203_v32 = vadd.f32 1.0, %v1613_v31  ;;  %v985_v24 = vsub.f32 1.0, %v984_v20  ;;  %1614 = vrcp.f32 %v2201_v21 }
 0x20d   :  { %vm1018_vm8 = vweird.f32 %v2201_v21 }
 0x20e   :  { %1170 = vmatmul.bf16.gmra.mxu3 %v1078_v14  ;;  %v1000_v14 = vsub.f32 1.0, %v999_v8  ;;  %1616 = vrcp.f32 %v2203_v32  ;;  %v986_v34 = vmul.f32 %v1607_v2, %v985_v24  ;;  %vm1033_vm10 = vweird.f32 %v2203_v32 }
 0x20f   :  { %v1039_v33 = vand.u32 2147483648, %v2203_v32  ;;  %v1037_v63 = vand.u32 2147483647, %v2203_v32 }
 0x210   :  { %v1001_v37 = vmul.f32 %v1609_v13, %v1000_v14  ;;  %v987_v27 = vadd.f32 %v1607_v2, %v986_v34 }
 0x211   :  { %v719_v42 = vpop.f32.mrf.mxu2  ;;  %vm1038_vm15 = vcmp.eq.f32.partialorder %v1037_v63, 8.507059e+37 }
 0x212   :  { %v1067_v3 = vmul.f32 %v1051_v55, %v719_v42  ;;  %v1615_v39 = vpop.eup %1614  ;;  %v1002_v42 = vadd.f32 %v1609_v13, %v1001_v37  ;;  %v991_v50 = vsel %vm990_vm4, %v1607_v2, %v987_v27  ;;  %v1040_v2 = vor.u32 1.1754944e-38, %v1039_v33 }
 0x213   :  { %v1014_v52 = vmul.f32 %v1615_v39, %v2201_v21  ;;  %v996_v41 = vsel %vm993_vm6, %v995_v26, %v991_v50  ;;  %vm1019_vm9 = vweird.f32 %v1615_v39 }
 0x214   :  { %v1617_v45 = vpop.eup %1616  ;;  %v1006_v53 = vsel %vm1005_vm5, %v1609_v13, %v1002_v42  ;;  %v1055_v55 = vmul.f32 %v996_v41, %v2084_v46  ;;  %vm1020_vm12 = vmor %vm1018_vm8, %vm1019_vm9  ;;  %v1022_v46 = vand.u32 2147483647, %v2201_v21 }
 0x215   :  { %v1029_v54 = vmul.f32 %v1617_v45, %v2203_v32  ;;  %v1011_v4 = vsel %vm1008_vm7, %v1010_v48, %v1006_v53  ;;  %v1015_v12 = vsub.f32 1.0, %v1014_v52  ;;  %vm1034_vm11 = vweird.f32 %v1617_v45 }
 0x216   :  { %vm1035_vm13 = vmor %vm1033_vm10, %vm1034_vm11  ;;  %vm1023_vm14 = vcmp.eq.f32.partialorder %v1022_v46, 8.507059e+37 }
 0x217   :  { %v1030_v7 = vsub.f32 1.0, %v1029_v54 }
 0x219   :  { %v721_v60 = vpop.f32.mrf.mxu2  ;;  %v1031_v61 = vmul.f32 %v1617_v45, %v1030_v7 }
 0x21a   :  { %v1068_v38 = vmul.f32 %v1052_v56, %v721_v60  ;;  %v1056_v56 = vmul.f32 %v1011_v4, %v2118_v0  ;;  %v1016_v60 = vmul.f32 %v1615_v39, %v1015_v12 }
 0x21b   :  { %v1032_v0 = vadd.f32 %v1617_v45, %v1031_v61 }
 0x21c   :  { %v1079_v5 = vpack.c.bf16 %v1068_v38, %v1067_v3  ;;  %v1017_v28 = vadd.f32 %v1615_v39, %v1016_v60 }
 0x21d   :  { %v1036_v9 = vsel %vm1035_vm13, %v1617_v45, %v1032_v0 }
 0x21e   :  { %1175 = vmatmul.bf16.gmra.mxu3 %v1079_v5  ;;  %v1024_v5 = vand.u32 2147483648, %v2201_v21  ;;  %v1021_v6 = vsel %vm1020_vm12, %v1615_v39, %v1017_v28  ;;  %v1041_v25 = vsel %vm1038_vm15, %v1040_v2, %v1036_v9 }
 0x21f   :  { %v1058_v29 = vmul.f32 %v1041_v25, %v2171_v10 }
 0x220   :  { %v1025_v1 = vor.u32 1.1754944e-38, %v1024_v5 }
 0x221   :  { %v724_v16 = vpop.f32.mrf.mxu2 }
 0x222   :  { %v1069_v22 = vmul.f32 %v1053_v43, %v724_v16  ;;  %v1026_v13 = vsel %vm1023_vm14, %v1025_v1, %v1021_v6 }
 0x223   :  { %v1057_v15 = vmul.f32 %v1026_v13, %v2141_v47 }
 0x229   :  { %v726_v35 = vpop.f32.mrf.mxu2 }
 0x22a   :  { %v1070_v40 = vmul.f32 %v1054_v51, %v726_v35 }
 0x22c   :  { %v1080_v58 = vpack.c.bf16 %v1070_v40, %v1069_v22 }
 0x22e   :  { %1180 = vmatmul.bf16.gmra.mxu3 %v1080_v58 }
 0x231   :  { %v729_v49 = vpop.f32.mrf.mxu2 }
 0x232   :  { %v1071_v62 = vmul.f32 %v1055_v55, %v729_v49 }
 0x239   :  { %v731_v57 = vpop.f32.mrf.mxu2 }
 0x23a   :  { %v1072_v3 = vmul.f32 %v1056_v56, %v731_v57 }
 0x23c   :  { %v1081_v38 = vpack.c.bf16 %v1072_v3, %v1071_v62 }
 0x23e   :  { %1185 = vmatmul.bf16.gmra.mxu3 %v1081_v38 }
 0x241   :  { %v734_v36 = vpop.f32.mrf.mxu2 }
 0x242   :  { %v1073_v31 = vmul.f32 %v1057_v15, %v734_v36 }
 0x249   :  { %v736_v16 = vpop.f32.mrf.mxu2 }
 0x24a   :  { %v1074_v30 = vmul.f32 %v1058_v29, %v736_v16 }
 0x24c   :  { %v1082_v17 = vpack.c.bf16 %v1074_v30, %v1073_v31 }
 0x24e   :  { %1190 = vmatmul.bf16.gmra.mxu3 %v1082_v17 }
 0x261   :  { %v1156_v20 = vpop.f32.mrf.mxu3 }
 0x269   :  { %v1158_v8 = vpop.f32.mrf.mxu3 }
 0x26a   :  { %v1468_v21 = vpack.c.bf16 %v1158_v8, %v1156_v20 }
 0x26c   :  { %1469 = vst [vmem:[#allocation10] sm:$0xff] %v1468_v21  }
 0x271   :  { %v1161_v23 = vpop.f32.mrf.mxu3 }
 0x279   :  { %v1163_v19 = vpop.f32.mrf.mxu3 }
 0x27a   :  { %v1473_v32 = vpack.c.bf16 %v1163_v19, %v1161_v23 }
 0x27c   :  { %1505 = vst [vmem:[#allocation10 + $0x8] sm:$0xff] %v1473_v32  }
 0x281   :  { %v1166_v24 = vpop.f32.mrf.mxu3 }
 0x289   :  { %v1168_v14 = vpop.f32.mrf.mxu3 }
 0x28a   :  { %v1478_v43 = vpack.c.bf16 %v1168_v14, %v1166_v24 }
 0x28c   :  { %1506 = vst [vmem:[#allocation10 + $0x10] sm:$0xff] %v1478_v43  }
 0x291   :  { %v1171_v47 = vpop.f32.mrf.mxu3 }
 0x299   :  { %v1173_v51 = vpop.f32.mrf.mxu3 }
 0x29a   :  { %v1483_v10 = vpack.c.bf16 %v1173_v51, %v1171_v47 }
 0x29c   :  { %1507 = vst [vmem:[#allocation10 + $0x18] sm:$0xff] %v1483_v10  }
 0x2a1   :  { %v1176_v35 = vpop.f32.mrf.mxu3 }
 0x2a9   :  { %v1178_v34 = vpop.f32.mrf.mxu3 }
 0x2aa   :  { %v1488_v37 = vpack.c.bf16 %v1178_v34, %v1176_v35 }
 0x2ac   :  { %1508 = vst [vmem:[#allocation10 + $0x20] sm:$0xff] %v1488_v37  }
 0x2b1   :  { %v1181_v22 = vpop.f32.mrf.mxu3 }
 0x2b9   :  { %v1183_v40 = vpop.f32.mrf.mxu3 }
 0x2ba   :  { %v1493_v58 = vpack.c.bf16 %v1183_v40, %v1181_v22 }
 0x2bc   :  { %1509 = vst [vmem:[#allocation10 + $0x28] sm:$0xff] %v1493_v58  }
 0x2c1   :  { %v1186_v59 = vpop.f32.mrf.mxu3 }
 0x2c9   :  { %v1188_v18 = vpop.f32.mrf.mxu3 }
 0x2ca   :  { %v1498_v11 = vpack.c.bf16 %v1188_v18, %v1186_v59 }
 0x2cc   :  { %1510 = vst [vmem:[#allocation10 + $0x30] sm:$0xff] %v1498_v11  }
 0x2d1   :  { %v1191_v44 = vpop.f32.mrf.mxu3 }
 0x2d9   :  { %v1193_v39 = vpop.f32.mrf.mxu3 }
 0x2da   :  { %v1503_v27 = vpack.c.bf16 %v1193_v39, %v1191_v44 }
 0x2dc   :  { %1511 = vst [vmem:[#allocation10 + $0x38] sm:$0xff] %v1503_v27  }
 0x2dd   :  { %1240 = dma.vmem_to_hbm [thread:$0]  %s1233_s15, 1024, %s1235_s18, [#allocation4], %s1750_s30, %s1750_s30, %s1751_s6  }
 0x2de   :  { %1744 = dma.done.wait [#allocation4], 1024  }
 0x2df   :  { %1745 = vsyncadd [#allocation4], 4294966272 }
 0x2e0   :  { %1245 = vsyncpa [#allocation3], 1 }
 0x2e1   :  { %1246 = vsyncpa [#allocation6], 1 }
 0x2e2   :  { %1247 = vsyncpa [#allocation9], 1 }
 0x2e3   :  { %1248 = vsyncpa [#allocation4], 1 }

</bundles_post_ra>
